<compile_context>
chip_gen: v5e
topology: v5e:2x2
jax: 0.10.0
libtpu: 0.0.40
codegen_flags: <defaults>
</compile_context>

<pallas_src>
import jax
import jax.numpy as jnp
from jax.experimental import pallas as pl
from jax.experimental.pallas import tpu as pltpu


# ----------------------------------------------------------------------------- kernel

def _dwconv3x3_kernel(x_ref, w_ref, o_ref, xp_ref):
    """One (batch, channel-slab) tile of the depthwise 3x3 conv.

    x_ref : (1, H, W, TC)   input slab (channels-last; channels on lanes)
    w_ref : (3, 3, TC)      per-channel taps, w[ky, kx, c]
    o_ref : (1, H, W, TC)   output slab
    xp_ref: (H+2, W+2, TC)  VMEM scratch holding the zero-padded image
    """
    H = o_ref.shape[1]
    W = o_ref.shape[2]

    # Build the zero-padded image in VMEM.  Zeroing the whole scratch every
    # step keeps it correct under megacore grid splitting (each core owns its
    # own scratch) and costs only cheap VMEM writes, not HBM traffic.
    xp_ref[...] = jnp.zeros_like(xp_ref)
    xp_ref[1:H + 1, 1:W + 1, :] = x_ref[0]

    # 9 statically-unrolled taps: shifted VMEM slices * per-channel scalar.
    acc = xp_ref[0:H, 0:W, :] * w_ref[0, 0, :]
    for ky in range(3):
        for kx in range(3):
            if ky == 0 and kx == 0:
                continue
            acc = acc + xp_ref[ky:ky + H, kx:kx + W, :] * w_ref[ky, kx, :]
    o_ref[0] = acc.astype(o_ref.dtype)


def _choose_channel_tile(C, H, W, vmem_budget_bytes=12 * 1024 * 1024):
    """Largest channel slab that divides C, is a multiple of 128 (lane-dense)
    and keeps the (double-buffered in + out blocks + padded scratch) under a
    conservative VMEM budget."""
    per_chan = (2 * 2 * H * W + (H + 2) * (W + 2)) * 4  # f32 bytes per channel
    if C % 128 != 0:
        return C  # small / odd channel counts: take the full (lane-padded) slab
    cand = [t for t in range(128, C + 1, 128)
            if C % t == 0 and t * per_chan <= vmem_budget_bytes]
    return max(cand) if cand else 128


# ----------------------------------------------------------------------------- wrapper

def dwconv(x, w, H, W):
    """Depthwise 3x3, stride 1, pad 1, groups=C, no bias.

    x: (B, N, C) tokens with N = H*W
    w: (3, 3, C) depthwise taps; w[ky, kx, c] == torch_weight[c, 0, ky, kx]
    returns (B, N, C)
    """
    B, N, C = x.shape
    assert N == H * W, "token count must equal H*W"

    xi = x.reshape(B, H, W, C)            # metadata-only: tokens are row-major in (H, W)
    TC = _choose_channel_tile(C, H, W)
    grid = (B, C // TC)

    out = pl.pallas_call(
        _dwconv3x3_kernel,
        out_shape=jax.ShapeDtypeStruct((B, H, W, C), x.dtype),
        grid_spec=pltpu.PrefetchScalarGridSpec(
            num_scalar_prefetch=0,
            grid=grid,
            in_specs=[
                pl.BlockSpec((1, H, W, TC), lambda b, c: (b, 0, 0, c)),
                pl.BlockSpec((3, 3, TC), lambda b, c: (0, 0, c)),
            ],
            out_specs=pl.BlockSpec((1, H, W, TC), lambda b, c: (b, 0, 0, c)),
            scratch_shapes=[pltpu.VMEM((H + 2, W + 2, TC), x.dtype)],
        ),
        compiler_params=pltpu.CompilerParams(
            dimension_semantics=("parallel", "parallel"),
        ),
    )(xi, w)

    return out.reshape(B, N, C)


# ----------------------------------------------------------------------------- main

if __name__ == "__main__":
    B, H, W, C = 2, 16, 16, 128
    N = H * W

    key = jax.random.PRNGKey(0)
    k1, k2 = jax.random.split(key)
    x = jax.random.normal(k1, (B, N, C), jnp.float32)

    # Depthwise weights in the PyTorch Conv2d layout (C, 1, 3, 3), converted to (3, 3, C).
    w_torch = 0.1 * jax.random.normal(k2, (C, 1, 3, 3), jnp.float32)
    w = jnp.transpose(w_torch[:, 0], (1, 2, 0))              # (3, 3, C)

    fn = jax.jit(dwconv, static_argnums=(2, 3))
    y = fn(x, w, H, W)
    jax.block_until_ready(y)
    assert y.shape == (B, N, C)

    # Plain-JAX reference (same math) for a numerical sanity check.
    xi = x.reshape(B, H, W, C)
    xpad = jnp.pad(xi, ((0, 0), (1, 1), (1, 1), (0, 0)))
    ref = jnp.zeros((B, H, W, C), jnp.float32)
    for ky in range(3):
        for kx in range(3):
            ref = ref + xpad[:, ky:ky + H, kx:kx + W, :] * w[ky, kx]
    ref = ref.reshape(B, N, C)
    assert jnp.allclose(y, ref, atol=1e-5, rtol=1e-5), float(jnp.max(jnp.abs(y - ref)))

    print("KERNEL_OK")
</pallas_src>

<mosaic_0001>
module attributes {stable_mosaic.version = 11 : i64} {
  func.func @_dwconv3x3_kernel(%arg0: i32, %arg1: i32, %arg2: memref<1x16x16x128xf32, #tpu.memory_space<vmem>>, %arg3: memref<3x3x128xf32, #tpu.memory_space<vmem>>, %arg4: memref<1x16x16x128xf32, #tpu.memory_space<vmem>>, %arg5: memref<18x18x128xf32, #tpu.memory_space<vmem>>) attributes {dimension_semantics = [#tpu.dimension_semantics<parallel>, #tpu.dimension_semantics<parallel>], iteration_bounds = array<i64: 2, 1>, scalar_prefetch = 0 : i64, scratch_operands = 1 : i64, tpu.core_type = #tpu.core_type<tc>, window_params = [{transform_indices = @transform_0, window_bounds = array<i64: 1, 16, 16, 128>}, {transform_indices = @transform_1, window_bounds = array<i64: 3, 3, 128>}, {transform_indices = @transform_2, window_bounds = array<i64: 1, 16, 16, 128>}]} {
    %cst = arith.constant 0.000000e+00 : f32
    %0 = vector.broadcast %cst : f32 to vector<18x18x128xf32>
    %c0 = arith.constant 0 : index
    %c0_0 = arith.constant 0 : index
    %c0_1 = arith.constant 0 : index
    %1 = vector.load %arg5[%c0, %c0_0, %c0_1] : memref<18x18x128xf32, #tpu.memory_space<vmem>>, vector<18x18x128xf32>
    tpu.vector_store %arg5[%c0, %c0_0, %c0_1], %0 {strides = array<i32>} : memref<18x18x128xf32, #tpu.memory_space<vmem>>, vector<18x18x128xf32>,
    %c0_2 = arith.constant 0 : index
    %c0_3 = arith.constant 0 : index
    %c0_4 = arith.constant 0 : index
    %c0_5 = arith.constant 0 : index
    %2 = vector.load %arg2[%c0_2, %c0_3, %c0_4, %c0_5] : memref<1x16x16x128xf32, #tpu.memory_space<vmem>>, vector<1x16x16x128xf32>
    %3 = vector.shape_cast %2 : vector<1x16x16x128xf32> to vector<16x16x128xf32>
    %c1 = arith.constant 1 : index
    %c1_6 = arith.constant 1 : index
    %c0_7 = arith.constant 0 : index
    %4 = vector.load %arg5[%c1, %c1_6, %c0_7] : memref<18x18x128xf32, #tpu.memory_space<vmem>>, vector<16x16x128xf32>
    tpu.vector_store %arg5[%c1, %c1_6, %c0_7], %3 {strides = array<i32>} : memref<18x18x128xf32, #tpu.memory_space<vmem>>, vector<16x16x128xf32>,
    %c0_8 = arith.constant 0 : index
    %c0_9 = arith.constant 0 : index
    %c0_10 = arith.constant 0 : index
    %5 = vector.load %arg5[%c0_8, %c0_9, %c0_10] : memref<18x18x128xf32, #tpu.memory_space<vmem>>, vector<16x16x128xf32>
    %c0_11 = arith.constant 0 : index
    %c0_12 = arith.constant 0 : index
    %c0_13 = arith.constant 0 : index
    %6 = vector.load %arg3[%c0_11, %c0_12, %c0_13] : memref<3x3x128xf32, #tpu.memory_space<vmem>>, vector<1x1x128xf32>
    %7 = vector.shape_cast %6 : vector<1x1x128xf32> to vector<128xf32>
    %8 = vector.shape_cast %7 : vector<128xf32> to vector<1x1x128xf32>
    %9 = vector.broadcast %8 : vector<1x1x128xf32> to vector<16x16x128xf32>
    %10 = arith.mulf %5, %9 : vector<16x16x128xf32>
    %c0_14 = arith.constant 0 : index
    %c1_15 = arith.constant 1 : index
    %c0_16 = arith.constant 0 : index
    %11 = vector.load %arg5[%c0_14, %c1_15, %c0_16] : memref<18x18x128xf32, #tpu.memory_space<vmem>>, vector<16x16x128xf32>
    %c0_17 = arith.constant 0 : index
    %c1_18 = arith.constant 1 : index
    %c0_19 = arith.constant 0 : index
    %12 = vector.load %arg3[%c0_17, %c1_18, %c0_19] : memref<3x3x128xf32, #tpu.memory_space<vmem>>, vector<1x1x128xf32>
    %13 = vector.shape_cast %12 : vector<1x1x128xf32> to vector<128xf32>
    %14 = vector.shape_cast %13 : vector<128xf32> to vector<1x1x128xf32>
    %15 = vector.broadcast %14 : vector<1x1x128xf32> to vector<16x16x128xf32>
    %16 = arith.mulf %11, %15 : vector<16x16x128xf32>
    %17 = arith.addf %10, %16 : vector<16x16x128xf32>
    %c0_20 = arith.constant 0 : index
    %c2 = arith.constant 2 : index
    %c0_21 = arith.constant 0 : index
    %18 = vector.load %arg5[%c0_20, %c2, %c0_21] : memref<18x18x128xf32, #tpu.memory_space<vmem>>, vector<16x16x128xf32>
    %c0_22 = arith.constant 0 : index
    %c2_23 = arith.constant 2 : index
    %c0_24 = arith.constant 0 : index
    %19 = vector.load %arg3[%c0_22, %c2_23, %c0_24] : memref<3x3x128xf32, #tpu.memory_space<vmem>>, vector<1x1x128xf32>
    %20 = vector.shape_cast %19 : vector<1x1x128xf32> to vector<128xf32>
    %21 = vector.shape_cast %20 : vector<128xf32> to vector<1x1x128xf32>
    %22 = vector.broadcast %21 : vector<1x1x128xf32> to vector<16x16x128xf32>
    %23 = arith.mulf %18, %22 : vector<16x16x128xf32>
    %24 = arith.addf %17, %23 : vector<16x16x128xf32>
    %c1_25 = arith.constant 1 : index
    %c0_26 = arith.constant 0 : index
    %c0_27 = arith.constant 0 : index
    %25 = vector.load %arg5[%c1_25, %c0_26, %c0_27] : memref<18x18x128xf32, #tpu.memory_space<vmem>>, vector<16x16x128xf32>
    %c1_28 = arith.constant 1 : index
    %c0_29 = arith.constant 0 : index
    %c0_30 = arith.constant 0 : index
    %26 = vector.load %arg3[%c1_28, %c0_29, %c0_30] : memref<3x3x128xf32, #tpu.memory_space<vmem>>, vector<1x1x128xf32>
    %27 = vector.shape_cast %26 : vector<1x1x128xf32> to vector<128xf32>
    %28 = vector.shape_cast %27 : vector<128xf32> to vector<1x1x128xf32>
    %29 = vector.broadcast %28 : vector<1x1x128xf32> to vector<16x16x128xf32>
    %30 = arith.mulf %25, %29 : vector<16x16x128xf32>
    %31 = arith.addf %24, %30 : vector<16x16x128xf32>
    %c1_31 = arith.constant 1 : index
    %c1_32 = arith.constant 1 : index
    %c0_33 = arith.constant 0 : index
    %32 = vector.load %arg5[%c1_31, %c1_32, %c0_33] : memref<18x18x128xf32, #tpu.memory_space<vmem>>, vector<16x16x128xf32>
    %c1_34 = arith.constant 1 : index
    %c1_35 = arith.constant 1 : index
    %c0_36 = arith.constant 0 : index
    %33 = vector.load %arg3[%c1_34, %c1_35, %c0_36] : memref<3x3x128xf32, #tpu.memory_space<vmem>>, vector<1x1x128xf32>
    %34 = vector.shape_cast %33 : vector<1x1x128xf32> to vector<128xf32>
    %35 = vector.shape_cast %34 : vector<128xf32> to vector<1x1x128xf32>
    %36 = vector.broadcast %35 : vector<1x1x128xf32> to vector<16x16x128xf32>
    %37 = arith.mulf %32, %36 : vector<16x16x128xf32>
    %38 = arith.addf %31, %37 : vector<16x16x128xf32>
    %c1_37 = arith.constant 1 : index
    %c2_38 = arith.constant 2 : index
    %c0_39 = arith.constant 0 : index
    %39 = vector.load %arg5[%c1_37, %c2_38, %c0_39] : memref<18x18x128xf32, #tpu.memory_space<vmem>>, vector<16x16x128xf32>
    %c1_40 = arith.constant 1 : index
    %c2_41 = arith.constant 2 : index
    %c0_42 = arith.constant 0 : index
    %40 = vector.load %arg3[%c1_40, %c2_41, %c0_42] : memref<3x3x128xf32, #tpu.memory_space<vmem>>, vector<1x1x128xf32>
    %41 = vector.shape_cast %40 : vector<1x1x128xf32> to vector<128xf32>
    %42 = vector.shape_cast %41 : vector<128xf32> to vector<1x1x128xf32>
    %43 = vector.broadcast %42 : vector<1x1x128xf32> to vector<16x16x128xf32>
    %44 = arith.mulf %39, %43 : vector<16x16x128xf32>
    %45 = arith.addf %38, %44 : vector<16x16x128xf32>
    %c2_43 = arith.constant 2 : index
    %c0_44 = arith.constant 0 : index
    %c0_45 = arith.constant 0 : index
    %46 = vector.load %arg5[%c2_43, %c0_44, %c0_45] : memref<18x18x128xf32, #tpu.memory_space<vmem>>, vector<16x16x128xf32>
    %c2_46 = arith.constant 2 : index
    %c0_47 = arith.constant 0 : index
    %c0_48 = arith.constant 0 : index
    %47 = vector.load %arg3[%c2_46, %c0_47, %c0_48] : memref<3x3x128xf32, #tpu.memory_space<vmem>>, vector<1x1x128xf32>
    %48 = vector.shape_cast %47 : vector<1x1x128xf32> to vector<128xf32>
    %49 = vector.shape_cast %48 : vector<128xf32> to vector<1x1x128xf32>
    %50 = vector.broadcast %49 : vector<1x1x128xf32> to vector<16x16x128xf32>
    %51 = arith.mulf %46, %50 : vector<16x16x128xf32>
    %52 = arith.addf %45, %51 : vector<16x16x128xf32>
    %c2_49 = arith.constant 2 : index
    %c1_50 = arith.constant 1 : index
    %c0_51 = arith.constant 0 : index
    %53 = vector.load %arg5[%c2_49, %c1_50, %c0_51] : memref<18x18x128xf32, #tpu.memory_space<vmem>>, vector<16x16x128xf32>
    %c2_52 = arith.constant 2 : index
    %c1_53 = arith.constant 1 : index
    %c0_54 = arith.constant 0 : index
    %54 = vector.load %arg3[%c2_52, %c1_53, %c0_54] : memref<3x3x128xf32, #tpu.memory_space<vmem>>, vector<1x1x128xf32>
    %55 = vector.shape_cast %54 : vector<1x1x128xf32> to vector<128xf32>
    %56 = vector.shape_cast %55 : vector<128xf32> to vector<1x1x128xf32>
    %57 = vector.broadcast %56 : vector<1x1x128xf32> to vector<16x16x128xf32>
    %58 = arith.mulf %53, %57 : vector<16x16x128xf32>
    %59 = arith.addf %52, %58 : vector<16x16x128xf32>
    %c2_55 = arith.constant 2 : index
    %c2_56 = arith.constant 2 : index
    %c0_57 = arith.constant 0 : index
    %60 = vector.load %arg5[%c2_55, %c2_56, %c0_57] : memref<18x18x128xf32, #tpu.memory_space<vmem>>, vector<16x16x128xf32>
    %c2_58 = arith.constant 2 : index
    %c2_59 = arith.constant 2 : index
    %c0_60 = arith.constant 0 : index
    %61 = vector.load %arg3[%c2_58, %c2_59, %c0_60] : memref<3x3x128xf32, #tpu.memory_space<vmem>>, vector<1x1x128xf32>
    %62 = vector.shape_cast %61 : vector<1x1x128xf32> to vector<128xf32>
    %63 = vector.shape_cast %62 : vector<128xf32> to vector<1x1x128xf32>
    %64 = vector.broadcast %63 : vector<1x1x128xf32> to vector<16x16x128xf32>
    %65 = arith.mulf %60, %64 : vector<16x16x128xf32>
    %66 = arith.addf %59, %65 : vector<16x16x128xf32>
    %c0_61 = arith.constant 0 : index
    %c0_62 = arith.constant 0 : index
    %c0_63 = arith.constant 0 : index
    %c0_64 = arith.constant 0 : index
    %67 = vector.load %arg4[%c0_61, %c0_62, %c0_63, %c0_64] : memref<1x16x16x128xf32, #tpu.memory_space<vmem>>, vector<1x16x16x128xf32>
    %68 = vector.shape_cast %67 : vector<1x16x16x128xf32> to vector<16x16x128xf32>
    %69 = vector.shape_cast %66 : vector<16x16x128xf32> to vector<1x16x16x128xf32>
    tpu.vector_store %arg4[%c0_61, %c0_62, %c0_63, %c0_64], %69 {strides = array<i32>} : memref<1x16x16x128xf32, #tpu.memory_space<vmem>>, vector<1x16x16x128xf32>,
    return
  }
  func.func @transform_0(%arg0: i32, %arg1: i32) -> (i32, i32, i32, i32) {
    %c0_i32 = arith.constant 0 : i32
    %c0_i32_0 = arith.constant 0 : i32
    %c0_i32_1 = arith.constant 0 : i32
    return %arg0, %c0_i32, %c0_i32_0, %arg1 : i32, i32, i32, i32
  }
  func.func @transform_1(%arg0: i32, %arg1: i32) -> (i32, i32, i32) {
    %c0_i32 = arith.constant 0 : i32
    %c0_i32_0 = arith.constant 0 : i32
    %c0_i32_1 = arith.constant 0 : i32
    return %c0_i32, %c0_i32_0, %arg1 : i32, i32, i32
  }
  func.func @transform_2(%arg0: i32, %arg1: i32) -> (i32, i32, i32, i32) {
    %c0_i32 = arith.constant 0 : i32
    %c0_i32_0 = arith.constant 0 : i32
    %c0_i32_1 = arith.constant 0 : i32
    return %arg0, %c0_i32, %c0_i32_0, %arg1 : i32, i32, i32, i32
  }
}

</mosaic_0001>

<bundles_post_ra>
// kernel: dwconv.1
= control target key start
LH: loop header
LB: loop body
LE: loop exit
PB: predicated region body
PF: predicated region fallthrough
CT: control target
= control target key end

     0   :  { %7 = vsyncpa [#allocation4], 0  ;;  %s2329_s0 = inlined_call_operand.hbm [shape: f32[2,16,16,128], index: 0, kind: input, shape index: {}]   ;;  %s2330_s1 = inlined_call_operand.hbm [shape: f32[3,3,128], index: 1, kind: input, shape index: {}]   ;;  %s2331_s2 = inlined_call_operand.hbm [shape: f32[2,16,16,128], index: 2, kind: output, shape index: {}]  }
   0x1   :  { %9 = vsyncpa [#allocation4 + $0x1], 0 }
   0x2   :  { %10 = vsyncpa [#allocation7], 0 }
   0x3   :  { %11 = vsyncpa [#allocation5], 0 }
   0x4   :  { %13 = vsyncpa [#allocation5 + $0x1], 0  ;;  %s1612_s9 = smov 0   ;;  %s1614_s10 = smov 0  }
   0x5   :  { %s1616_s11 = smov 0   ;;  %s1618_s12 = smov 0  }
   0x6   :  { %s1620_s13 = smov 0   ;;  %s1622_s14 = smov 0  }
   0x7 LB: > { %s1323_s15 = sadd.s32 4294967295, %s1587_s14   ;;  %s1324_s16 = sadd.s32 4294967294, %s1587_s14   ;;  %s1587_s14 = sphi %s1622_s14, %s19_s14   ;;  %s1583_s13 = sphi %s1620_s13, %s2354_s13   ;;  %s1579_s12 = sphi %s1618_s12, %s2353_s12   ;;  %s1575_s11 = sphi %s1616_s11, %s2352_s11   ;;  %s1571_s10 = sphi %s1614_s10, %s2351_s10   ;;  %s1567_s9 = sphi %s1612_s9, %s2350_s9  }
   0x8   : > { %p53_p0 = scmp.ne.s32.totalorder %s1571_s10, %s1567_s9  ;;  %p1646_p1 = scmp.eq.s32.totalorder %s1323_s15, 0 }
   0x9   : > { %p1650_p2 = scmp.eq.s32.totalorder %s1323_s15, 1  ;;  %p111_p3 = scmp.eq.s32.totalorder %s1324_s16, 1 }
   0xa   : > { %p1656_p4 = por %p1646_p1, %p53_p0  ;;  %p1325_p5 = scmp.ge.s32.totalorder %s1587_s14, 1 }
   0xb   : > { %p1661_p6 = por %p111_p3, %p53_p0  ;;  %p118_p7 = scmp.lt.s32.totalorder %s1587_s14, 3 }
   0xc   : > { %s131_s23 = sshll.u32 %s2330_s1, 4  ;;  %s1589_s25 = smov [#allocation6]   ;;  %s132_s23 = int_to_ptr.hbm [resolvable:$true] %s131_s23 }
   0xd   : > { %p1669_p8 = pnand %p1325_p5, %p118_p7  ;;  %s133_s26 = sshll.u32 %s1589_s25, 4  ;;  %s134_s26 = int_to_ptr.vmem [resolvable:$true] %s133_s26 }
   0xe   : > { %p1327_p11 = scmp.ge.s32.totalorder %s1587_s14, 2  ;;  %s1590_s27 = smov 64  }
   0xf   : > { %p1350_p9 = pneg %p1669_p8  ;;  %s1591_s28 = smov 4  }
  0x10   : > { %s31_s29 = sadd.s32 1, %s1583_s13  ;;  %s40_s30 = sadd.s32 1, %s1575_s11 }
  0x11   : > { %p1351_p10 = pnand %p1350_p9, %p1646_p1  ;;  %p33_p12 = scmp.ge.s32.totalorder %s31_s29, 2 }
  0x12   : > { %p47_p13 = scmp.ne.s32.totalorder %s1575_s11, %s1571_s10  ;;  %p48_p0 = scmp.eq.s32.totalorder %s1587_s14, 0 }
  0x13   : > { %1353 = dma.hbm_to_vmem [thread:$0]  (!%p1351_p10), %s132_s23, 192, %s134_s26, [#allocation7], %s1590_s27, %s1590_s27, %s1591_s28  }
  0x14   : > { %s2356_s29 = smov (%p33_p12, %s31_s29), 0  ;;  %p1685_p3 = por %p48_p0, %p47_p13 }
  0x15   : > { %p1691_p5 = por %p1650_p2, %p47_p13  ;;  %s35_s5 = ssub.s32 %s1583_s13, %s2356_s29 }
  0x16   : > { %p1363_p7 = scmp.lt.s32.totalorder %s1587_s14, 2  ;;  %p38_p9 = scmp.eq.s32.totalorder %s35_s5, 0 }
  0x17   : > { %s147_s6 = sand.u32 1, %s1575_s11   ;;  %s1340_s15 = sshll.u32 %s1583_s13, 8 }
  0x18   : > { %s1328_s7 = sshll.u32 %s147_s6, 8  ;;  %s157_s22 = scalar_lea.hbm %s2329_s0, %s1340_s15 }
  0x19   : > { %s1700_s8 = scalar_select %p38_p9, %s1575_s11, %s40_s30  }
  0x1a   : > { %s151_s23 = scalar_lea.vmem [#allocation3], %s1328_s7  ;;  %s158_s18 = sshll.u32 %s157_s22, 4  ;;  %s159_s18 = int_to_ptr.hbm [resolvable:$true] %s158_s18 }
  0x1b   : > { %s160_s25 = sshll.u32 %s151_s23, 4  ;;  %p1355_p2 = pnand %p1363_p7, %p1685_p3  ;;  %s161_s25 = int_to_ptr.vmem [resolvable:$true] %s160_s25 }
  0x1c   : > { %s148_s26 = scalar_lea.sflag [#allocation4], %s147_s6  ;;  %s1592_s27 = smov 128  }
  0x1d   : > { %s1593_s28 = smov 8   ;;  %172 = sbr.rel (%p1669_p8) target bundleno = 246 (0xf6), region = 28 }
  0x1e   : > { %1357 = dma.hbm_to_vmem [thread:$0]  (!%p1355_p2), %s159_s18, 4096, %s161_s25, %s148_s26, %s1592_s27, %s1592_s27, %s1593_s28  }
  0x22   : > { %s1711_s30 = sand.u32 1, %s1571_s10  }
  0x23   : > { %s1332_s5 = sshll.u32 %s1711_s30, 8  ;;  %s175_s7 = scalar_lea.sflag [#allocation4], %s1711_s30 }
  0x24   : > { %s1717_s15 = scalar_lea.vmem [#allocation3], %s1332_s5 }
  0x25   : > { %1554 = dma.done.wait (%p1656_p4), %s175_s7, 4096  }
  0x26   : > { %1556 = vsyncadd (%p1656_p4), %s175_s7, 4294963200 }
  0x27   : > { %1558 = dma.done.wait (%p1646_p1), [#allocation7], 192  }
  0x28   : > { %1560 = vsyncadd (%p1646_p1), [#allocation7], 4294967104  ;;  %v1594_v0 = vmov 0.0   ;;  %v259_v1 = vld [vmem:[%s1717_s15] sm:$0xff]  ;;  %v260_v2 = vld [vmem:[%s1717_s15 + $0x8] sm:$0xff]  ;;  %s1981_s17 = scalar_lea.vmem [#allocation8], %s1332_s5 }
  0x29   : > { %205 = vst [vmem:[#allocation2] sm:$0xff] %v1594_v0  ;;  %v261_v3 = vld [vmem:[%s1717_s15 + $0x10] sm:$0xff]  ;;  %v262_v4 = vld [vmem:[%s1717_s15 + $0x18] sm:$0xff]  ;;  %v1731_v5 = vld [vmem:[#allocation6] ss:$0 sm:$0xff]  ;;  %s1341_s19 = sshll.u32 %s1579_s12, 8 }
  0x2a   : > { %206 = vst [vmem:[#allocation2 + $0x8] sm:$0xff] %v1594_v0  ;;  %v1733_v8 = vld [vmem:[#allocation6 + $0x1] ss:$0 sm:$0xff]  ;;  %v1735_v9 = vld [vmem:[#allocation6 + $0x2] ss:$0 sm:$0xff]  ;;  %v358_v12 = vmul.f32 0.0, %v1731_v5  ;;  %s1222_s6 = scalar_lea.hbm %s2331_s2, %s1341_s19 }
  0x2b   : > { %207 = vst [vmem:[#allocation2 + $0x10] sm:$0x3] %v1594_v0  ;;  %v1738_v11 = vld [vmem:[%s1717_s15 + $0x20] sm:$0xff]  ;;  %v1742_v14 = vld [vmem:[%s1717_s15 + $0x28] sm:$0xff]  ;;  %v1748_v18 = vld [vmem:[%s1717_s15 + $0x30] sm:$0xff]  ;;  %v426_v29 = vmul.f32 %v1733_v8, %v259_v1  ;;  %v1776_v33 = vmul.f32 %v1733_v8, %v260_v2  ;;  %v1808_v48 = vmul.f32 %v1733_v8, %v261_v3  ;;  %v1826_v55 = vmul.f32 %v1733_v8, %v262_v4  ;;  %s1223_s12 = sshll.u32 %s1981_s17, 4  ;;  %s1224_s12 = int_to_ptr.vmem [resolvable:$true] %s1223_s12 }
  0x2c   : > { %208 = vst [vmem:[#allocation2 + $0x18] sm:$0xff] %v1594_v0  ;;  %v1750_v19 = vld [vmem:[#allocation6 + $0x5] ss:$0 sm:$0xff]  ;;  %v1755_v21 = vld [vmem:[%s1717_s15 + $0x38] sm:$0xff]  ;;  %v1757_v23 = vld [vmem:[#allocation6 + $0x4] ss:$0 sm:$0xff] }
  0x2d   : > { %209 = vst [vmem:[#allocation2 + $0x20] sm:$0xff] %v1594_v0  ;;  %v1761_v25 = vld [vmem:[%s1717_s15 + $0x40] sm:$0xff]  ;;  %v719_v26 = vmul.f32 %v1750_v19, %v259_v1  ;;  %v1764_v27 = vld [vmem:[#allocation6 + $0x9] ss:$0 sm:$0xff]  ;;  %v720_v28 = vmul.f32 %v1750_v19, %v260_v2  ;;  %v1773_v32 = vmul.f32 %v1750_v19, %v261_v3  ;;  %v1779_v34 = vmul.f32 %v1750_v19, %v262_v4  ;;  %v1783_v35 = vld [vmem:[%s1717_s15 + $0x50] sm:$0xff]  ;;  %s1225_s16 = sshll.u32 %s1222_s6, 4  ;;  %s1226_s16 = int_to_ptr.hbm [resolvable:$true] %s1225_s16 }
  0x2e   : > { %210 = vst [vmem:[#allocation2 + $0x28] sm:$0x3] %v1594_v0  ;;  %v1770_v30 = vld [vmem:[%s1717_s15 + $0x48] sm:$0xff]  ;;  %v1786_v36 = vld [vmem:[%s1717_s15 + $0x58] sm:$0xff]  ;;  %v1789_v38 = vmul.f32 %v1764_v27, %v261_v3  ;;  %v1792_v40 = vmul.f32 %v1764_v27, %v262_v4  ;;  %v1796_v41 = vmul.f32 %v1764_v27, %v1738_v11  ;;  %v1800_v44 = vld [vmem:[#allocation6 + $0x6] ss:$0 sm:$0xff]  ;;  %v1805_v47 = vmul.f32 %v1764_v27, %v1742_v14 }
  0x2f   : > { %211 = vst [vmem:[#allocation2 + $0x30] sm:$0xff] %v1594_v0  ;;  %v1812_v49 = vld [vmem:[%s1717_s15 + $0x60] sm:$0xff]  ;;  %v1814_v51 = vld [vmem:[#allocation6 + $0x8] ss:$0 sm:$0xff]  ;;  %v1819_v53 = vmul.f32 %v1750_v19, %v1738_v11  ;;  %v1823_v54 = vmul.f32 %v1764_v27, %v1748_v18  ;;  %v1832_v58 = vld [vmem:[#allocation6 + $0xa] ss:$0 sm:$0xff]  ;;  %v1837_v62 = vmul.f32 %v1750_v19, %v1742_v14 }
  0x30   : > { %212 = vst [vmem:[#allocation2 + $0x38] sm:$0xff] %v1594_v0  ;;  %v1830_v56 = vld [vmem:[%s1717_s15 + $0x68] sm:$0xff]  ;;  %v1841_v63 = vld [vmem:[%s1717_s15 + $0x70] sm:$0xff]  ;;  %s1210_s21 = scalar_lea.sflag [#allocation5], %s1711_s30  ;;  %s1515_s22 = sshra.s32 %s1226_s16, 4  ;;  %s1516_s22 = int_to_ptr.hbm [resolvable:$true] %s1515_s22 }
  0x31   : > { %213 = vst [vmem:[#allocation2 + $0x40] sm:$0x3] %v1594_v0  ;;  %v390_v6 = vld [vmem:[#allocation2 + $0x1] sm:$0xff]  ;;  %s1517_s23 = scalar_lea.hbm %s1516_s22, 256  ;;  %s1521_s26 = scalar_lea.hbm %s2331_s2, 512 }
  0x32   : > { %214 = vst [vmem:[#allocation2 + $0x48] sm:$0xff] %v1594_v0  ;;  %v488_v7 = vld [vmem:[#allocation2 + $0x2] sm:$0xff]  ;;  %v489_v13 = vld [vmem:[#allocation2 + $0xa] sm:$0xff]  ;;  %v424_v15 = vmul.f32 %v1733_v8, %v390_v6  ;;  %v1853_v6 = vmul.f32 %v1750_v19, %v1748_v18  ;;  %p1518_p1 = scmp.ne.s32.totalorder %s1516_s22, %s1517_s23  ;;  %p1522_p10 = scmp.lt.s32.totalorder %s1516_s22, %s2331_s2 }
  0x33   : > { %215 = vst [vmem:[#allocation2 + $0x50] sm:$0xff] %v1594_v0  ;;  %v391_v10 = vld [vmem:[#allocation2 + $0x9] sm:$0xff]  ;;  %v522_v16 = vmul.f32 %v1735_v9, %v488_v7  ;;  %v523_v20 = vmul.f32 %v1735_v9, %v489_v13  ;;  %p1523_p12 = scmp.lt.s32.totalorder %s1521_s26, %s1517_s23 }
  0x34   : > { %216 = vst [vmem:[#allocation2 + $0x58] sm:$0x3] %v1594_v0  ;;  %v425_v17 = vmul.f32 %v1733_v8, %v391_v10  ;;  %v456_v22 = vadd.f32 %v424_v15, %v358_v12  ;;  %v1857_v7 = vld [vmem:[%s1717_s15 + $0x78] sm:$0xff]  ;;  %p1519_p4 = pnand %p1518_p1, %p1691_p5 }
  0x35   : > { %217 = vst [vmem:[#allocation2 + $0x60] sm:$0xff] %v1594_v0  ;;  %p1524_p13 = por %p1523_p12, %p1522_p10 }
  0x36   : > { %218 = vst [vmem:[#allocation2 + $0x68] sm:$0xff] %v1594_v0  ;;  %v457_v24 = vadd.f32 %v425_v17, %v358_v12  ;;  %v554_v31 = vadd.f32 %v522_v16, %v456_v22  ;;  %p1520_p8 = pneg %p1519_p4 }
  0x37   : > { %219 = vst [vmem:[#allocation2 + $0x70] sm:$0x3] %v1594_v0 }
  0x38   : > { %220 = vst [vmem:[#allocation2 + $0x78] sm:$0xff] %v1594_v0  ;;  %v555_v39 = vadd.f32 %v523_v20, %v457_v24  ;;  %p1525_p0 = pnand %p1524_p13, %p1520_p8 }
  0x39   : > { %221 = vst [vmem:[#allocation2 + $0x80] sm:$0xff] %v1594_v0 }
  0x3a   : > { %222 = vst [vmem:[#allocation2 + $0x88] sm:$0x3] %v1594_v0 }
  0x3b   : > { %223 = vst [vmem:[#allocation2 + $0x90] sm:$0xff] %v1594_v0 }
  0x3c   : > { %224 = vst [vmem:[#allocation2 + $0x98] sm:$0xff] %v1594_v0 }
  0x3d   : > { %225 = vst [vmem:[#allocation2 + $0xa0] sm:$0x3] %v1594_v0 }
  0x3e   : > { %226 = vst [vmem:[#allocation2 + $0xa8] sm:$0xff] %v1594_v0 }
  0x3f   : > { %227 = vst [vmem:[#allocation2 + $0xb0] sm:$0xff] %v1594_v0 }
  0x40   : > { %228 = vst [vmem:[#allocation2 + $0xb8] sm:$0x3] %v1594_v0 }
  0x41   : > { %229 = vst [vmem:[#allocation2 + $0xc0] sm:$0xff] %v1594_v0 }
  0x42   : > { %230 = vst [vmem:[#allocation2 + $0xc8] sm:$0xff] %v1594_v0 }
  0x43   : > { %231 = vst [vmem:[#allocation2 + $0xd0] sm:$0x3] %v1594_v0 }
  0x44   : > { %232 = vst [vmem:[#allocation2 + $0xd8] sm:$0xff] %v1594_v0 }
  0x45   : > { %233 = vst [vmem:[#allocation2 + $0xe0] sm:$0xff] %v1594_v0 }
  0x46   : > { %234 = vst [vmem:[#allocation2 + $0xe8] sm:$0x3] %v1594_v0 }
  0x47   : > { %235 = vst [vmem:[#allocation2 + $0xf0] sm:$0xff] %v1594_v0 }
  0x48   : > { %236 = vst [vmem:[#allocation2 + $0xf8] sm:$0xff] %v1594_v0 }
  0x49   : > { %237 = vst [vmem:[#allocation2 + $0x100] sm:$0x3] %v1594_v0 }
  0x4a   : > { %238 = vst [vmem:[#allocation2 + $0x108] sm:$0xff] %v1594_v0 }
  0x4b   : > { %239 = vst [vmem:[#allocation2 + $0x110] sm:$0xff] %v1594_v0 }
  0x4c   : > { %240 = vst [vmem:[#allocation2 + $0x118] sm:$0x3] %v1594_v0 }
  0x4d   : > { %241 = vst [vmem:[#allocation2 + $0x120] sm:$0xff] %v1594_v0 }
  0x4e   : > { %242 = vst [vmem:[#allocation2 + $0x128] sm:$0xff] %v1594_v0 }
  0x4f   : > { %243 = vst [vmem:[#allocation2 + $0x130] sm:$0x3] %v1594_v0 }
  0x50   : > { %244 = vst [vmem:[#allocation2 + $0x138] sm:$0xff] %v1594_v0 }
  0x51   : > { %245 = vst [vmem:[#allocation2 + $0x140] sm:$0xff] %v1594_v0 }
  0x52   : > { %246 = vst [vmem:[#allocation2 + $0x148] sm:$0x3] %v1594_v0 }
  0x53   : > { %247 = vst [vmem:[#allocation2 + $0x150] sm:$0xff] %v1594_v0 }
  0x54   : > { %248 = vst [vmem:[#allocation2 + $0x158] sm:$0xff] %v1594_v0 }
  0x55   : > { %249 = vst [vmem:[#allocation2 + $0x160] sm:$0x3] %v1594_v0 }
  0x56   : > { %250 = vst [vmem:[#allocation2 + $0x168] sm:$0xff] %v1594_v0 }
  0x57   : > { %251 = vst [vmem:[#allocation2 + $0x170] sm:$0xff] %v1594_v0 }
  0x58   : > { %252 = vst [vmem:[#allocation2 + $0x178] sm:$0x3] %v1594_v0 }
  0x59   : > { %253 = vst [vmem:[#allocation2 + $0x180] sm:$0xff] %v1594_v0 }
  0x5a   : > { %254 = vst [vmem:[#allocation2 + $0x188] sm:$0xff] %v1594_v0 }
  0x5b   : > { %255 = vst [vmem:[#allocation2 + $0x190] sm:$0x3] %v1594_v0 }
  0x5c   : > { %256 = vst [vmem:[#allocation2 + $0x198] sm:$0xff] %v1594_v0 }
  0x5d   : > { %257 = vst [vmem:[#allocation2 + $0x1a0] sm:$0xff] %v1594_v0 }
  0x5e   : > { %258 = vst [vmem:[#allocation2 + $0x1a8] sm:$0x3] %v1594_v0 }
  0x5f   : > { %292 = vst [vmem:[#allocation2 + $0x19] sm:$0xff] %v259_v1 }
  0x60   : > { %293 = vst [vmem:[#allocation2 + $0x21] sm:$0xff] %v260_v2 }
  0x61   : > { %294 = vst [vmem:[#allocation2 + $0x31] sm:$0xff] %v261_v3  ;;  %v1845_v3 = vmul.f32 %v1764_v27, %v1755_v21 }
  0x62   : > { %295 = vst [vmem:[#allocation2 + $0x39] sm:$0xff] %v262_v4  ;;  %v1849_v4 = vmul.f32 %v1733_v8, %v1738_v11 }
  0x63   : > { %296 = vst [vmem:[#allocation2 + $0x49] sm:$0xff] %v1738_v11  ;;  %v1863_v11 = vld [vmem:[%s1717_s15 + $0x80] sm:$0xff] }
  0x64   : > { %297 = vst [vmem:[#allocation2 + $0x51] sm:$0xff] %v1742_v14 }
  0x65   : > { %298 = vst [vmem:[#allocation2 + $0x61] sm:$0xff] %v1748_v18 }
  0x66   : > { %299 = vst [vmem:[#allocation2 + $0x69] sm:$0xff] %v1755_v21  ;;  %v586_v37 = vld [vmem:[#allocation2 + $0x18] sm:$0xff] }
  0x67   : > { %300 = vst [vmem:[#allocation2 + $0x79] sm:$0xff] %v1761_v25  ;;  %v621_v42 = vmul.f32 %v1757_v23, %v586_v37  ;;  %v783_v43 = vld [vmem:[#allocation2 + $0x1a] sm:$0xff]  ;;  %v360_v46 = vmul.f32 %v1731_v5, %v586_v37  ;;  %v784_v59 = vld [vmem:[#allocation2 + $0x22] sm:$0xff] }
  0x68   : > { %v587_v45 = vld [vmem:[#allocation2 + $0x20] sm:$0xff]  ;;  %301 = vst [vmem:[#allocation2 + $0x81] sm:$0xff] %v1770_v30  ;;  %v882_v50 = vld [vmem:[#allocation2 + $0x30] sm:$0xff]  ;;  %v524_v61 = vmul.f32 %v1735_v9, %v783_v43  ;;  %v817_v12 = vmul.f32 %v1800_v44, %v783_v43  ;;  %v818_v22 = vmul.f32 %v1800_v44, %v784_v59 }
  0x69   : > { %v622_v52 = vmul.f32 %v1757_v23, %v587_v45  ;;  %302 = vst [vmem:[#allocation2 + $0x91] sm:$0xff] %v1783_v35  ;;  %v653_v57 = vadd.f32 %v621_v42, %v554_v31  ;;  %v458_v60 = vadd.f32 %v426_v29, %v360_v46  ;;  %v1079_v0 = vld [vmem:[#allocation2 + $0x32] sm:$0xff]  ;;  %v1080_v13 = vld [vmem:[#allocation2 + $0x3a] sm:$0xff]  ;;  %v623_v16 = vmul.f32 %v1757_v23, %v882_v50 }
  0x6a   : > { %303 = vst [vmem:[#allocation2 + $0x99] sm:$0xff] %v1786_v36  ;;  %v883_v2 = vld [vmem:[#allocation2 + $0x38] sm:$0xff]  ;;  %v917_v17 = vmul.f32 %v1814_v51, %v882_v50  ;;  %v361_v24 = vmul.f32 %v1731_v5, %v587_v45  ;;  %v1873_v31 = vmul.f32 %v1832_v58, %v1079_v0  ;;  %v884_v42 = vld [vmem:[#allocation2 + $0x48] sm:$0xff]  ;;  %v1883_v46 = vmul.f32 %v1832_v58, %v1080_v13 }
  0x6b   : > { %v654_v1 = vadd.f32 %v622_v52, %v555_v39  ;;  %304 = vst [vmem:[#allocation2 + $0xa9] sm:$0xff] %v1812_v49  ;;  %v751_v10 = vadd.f32 %v719_v26, %v653_v57  ;;  %v556_v15 = vadd.f32 %v524_v61, %v458_v60  ;;  %v1870_v26 = vld [vmem:[%s1717_s15 + $0x88] sm:$0xff]  ;;  %v918_v37 = vmul.f32 %v1814_v51, %v883_v2  ;;  %v1876_v43 = vld [vmem:[#allocation2 + $0x4a] sm:$0xff] }
  0x6c   : > { %2344 = vst [vmem:[#allocation12_spill] sm:$0xff] %v1857_v7  ;;  %v459_v52 = vadd.f32 %v1776_v33, %v361_v24  ;;  %v525_v57 = vmul.f32 %v1735_v9, %v784_v59  ;;  %v278_v60 = vld [vmem:[%s1717_s15 + $0x98] sm:$0xff]  ;;  %v919_v33 = vmul.f32 %v1814_v51, %v884_v42  ;;  %v1899_v59 = vmul.f32 %v1832_v58, %v1876_v43 }
  0x6d   : > { %305 = vst [vmem:[#allocation2 + $0xb1] sm:$0xff] %v1830_v56  ;;  %v752_v20 = vadd.f32 %v720_v28, %v654_v1  ;;  %v849_v29 = vadd.f32 %v817_v12, %v751_v10  ;;  %v655_v39 = vadd.f32 %v623_v16, %v556_v15  ;;  %v1880_v28 = vld [vmem:[%s1717_s15 + $0x90] sm:$0xff]  ;;  %v819_v10 = vmul.f32 %v1800_v44, %v1079_v0  ;;  %v1891_v12 = vld [vmem:[#allocation2 + $0x50] sm:$0xff] }
  0x6e   : > { %2345 = vst [vmem:[#allocation13_spill] sm:$0xff] %v1863_v11  ;;  %v362_v15 = vmul.f32 %v1731_v5, %v882_v50  ;;  %v279_v16 = vld [vmem:[%s1717_s15 + $0xa0] sm:$0xff] }
  0x6f   : > { %306 = vst [vmem:[#allocation2 + $0xc1] sm:$0xff] %v1841_v63  ;;  %v850_v45 = vadd.f32 %v818_v22, %v752_v20  ;;  %v949_v61 = vadd.f32 %v917_v17, %v849_v29  ;;  %v753_v1 = vadd.f32 %v1773_v32, %v655_v39  ;;  %v557_v20 = vadd.f32 %v525_v57, %v459_v52  ;;  %v280_v32 = vld [vmem:[%s1717_s15 + $0xa8] sm:$0xff] }
  0x70   : > { %2346 = vst [vmem:[#allocation14_spill] sm:$0xff] %v1870_v26  ;;  %v624_v17 = vmul.f32 %v1757_v23, %v883_v2  ;;  %v1904_v29 = vld [vmem:[#allocation2 + $0x52] sm:$0xff]  ;;  %v460_v50 = vadd.f32 %v1808_v48, %v362_v15  ;;  %v526_v39 = vmul.f32 %v1735_v9, %v1079_v0  ;;  %v820_v52 = vmul.f32 %v1800_v44, %v1080_v13 }
  0x71   : > { %307 = vst [vmem:[#allocation2 + $0xc9] sm:$0xff] %v1857_v7  ;;  %v950_v22 = vadd.f32 %v918_v37, %v850_v45  ;;  %v851_v24 = vadd.f32 %v819_v10, %v753_v1  ;;  %v920_v57 = vmul.f32 %v1814_v51, %v1891_v12  ;;  %v1912_v7 = vld [vmem:[#allocation2 + $0x60] sm:$0xff]  ;;  %v363_v37 = vmul.f32 %v1731_v5, %v883_v2  ;;  %v282_v45 = vld [vmem:[%s1717_s15 + $0xb8] sm:$0xff] }
  0x72   : > { %308 = vst [vmem:[#allocation2 + $0xd9] sm:$0xff] %v1863_v11  ;;  %v656_v11 = vadd.f32 %v624_v17, %v557_v20  ;;  %v1047_v48 = vadd.f32 %v1789_v38, %v949_v61  ;;  %v558_v10 = vadd.f32 %v526_v39, %v460_v50  ;;  %v625_v0 = vmul.f32 %v1757_v23, %v884_v42  ;;  %v1922_v17 = vld [vmem:[#allocation2 + $0x62] sm:$0xff]  ;;  %v284_v38 = vld [vmem:[%s1717_s15 + $0xc8] sm:$0xff] }
  0x73   : > { %309 = vst [vmem:[#allocation2 + $0xe1] sm:$0xff] %v1870_v26  ;;  %v281_v26 = vld [vmem:[%s1717_s15 + $0xb0] sm:$0xff]  ;;  %v951_v1 = vadd.f32 %v919_v33, %v851_v24  ;;  %v1116_v20 = vmul.f32 %v1832_v58, %v1904_v29  ;;  %v461_v2 = vadd.f32 %v1826_v55, %v363_v37  ;;  %v1048_v61 = vadd.f32 %v1792_v40, %v950_v22  ;;  %v286_v40 = vld [vmem:[%s1717_s15 + $0xd8] sm:$0xff] }
  0x74   : > { %310 = vst [vmem:[#allocation2 + $0xf1] sm:$0xff] %v1880_v28  ;;  %v754_v15 = vadd.f32 %v1779_v34, %v656_v11  ;;  %v657_v33 = vadd.f32 %v625_v0, %v558_v10  ;;  %v921_v34 = vmul.f32 %v1814_v51, %v1912_v7  ;;  %v285_v11 = vld [vmem:[%s1717_s15 + $0xd0] sm:$0xff]  ;;  %v626_v55 = vmul.f32 %v1757_v23, %v1891_v12  ;;  %v1943_v0 = vld [vmem:[#allocation2 + $0x68] sm:$0xff] }
  0x75   : > { %311 = vst [vmem:[#allocation2 + $0xf9] sm:$0xff] %v278_v60  ;;  %v283_v60 = vld [vmem:[%s1717_s15 + $0xc0] sm:$0xff]  ;;  %v1049_v22 = vadd.f32 %v1796_v41, %v951_v1  ;;  %v1117_v37 = vmul.f32 %v1832_v58, %v1922_v17  ;;  %v528_v41 = vmul.f32 %v1735_v9, %v1876_v43  ;;  %v822_v1 = vmul.f32 %v1800_v44, %v1904_v29 }
  0x76   : > { %312 = vst [vmem:[#allocation2 + $0x109] sm:$0xff] %v279_v16  ;;  %v527_v16 = vmul.f32 %v1735_v9, %v1080_v13  ;;  %v852_v24 = vadd.f32 %v820_v52, %v754_v15  ;;  %v364_v13 = vmul.f32 %v1731_v5, %v884_v42  ;;  %v755_v39 = vadd.f32 %v1819_v53, %v657_v33  ;;  %v287_v52 = vld [vmem:[%s1717_s15 + $0xe0] sm:$0xff]  ;;  %v288_v53 = vld [vmem:[%s1717_s15 + $0xe8] sm:$0xff]  ;;  %v289_v15 = vld [vmem:[%s1717_s15 + $0xf0] sm:$0xff] }
  0x77   : > { %313 = vst [vmem:[#allocation2 + $0x111] sm:$0xff] %v280_v32  ;;  %v821_v32 = vmul.f32 %v1800_v44, %v1876_v43  ;;  %v1945_v42 = vld [vmem:[#allocation2 + $0x6a] sm:$0xff]  ;;  %v365_v43 = vmul.f32 %v1731_v5, %v1891_v12  ;;  %v823_v12 = vmul.f32 %v1800_v44, %v1922_v17 }
  0x78   : > { %314 = vst [vmem:[#allocation2 + $0x121] sm:$0xff] %v281_v26  ;;  %v559_v50 = vadd.f32 %v527_v16, %v461_v2  ;;  %v1145_v26 = vadd.f32 %v1873_v31, %v1047_v48  ;;  %v1146_v31 = vadd.f32 %v1883_v46, %v1048_v61  ;;  %v922_v61 = vmul.f32 %v1814_v51, %v1943_v0 }
  0x79   : > { %315 = vst [vmem:[#allocation2 + $0x129] sm:$0xff] %v282_v45  ;;  %v952_v45 = vadd.f32 %v920_v57, %v852_v24  ;;  %v853_v48 = vadd.f32 %v821_v32, %v755_v39  ;;  %v627_v57 = vmul.f32 %v1757_v23, %v1912_v7  ;;  %v1118_v33 = vmul.f32 %v1832_v58, %v1945_v42  ;;  %v888_v24 = vld [vmem:[#allocation2 + $0x78] sm:$0xff] }
  0x7a   : > { %316 = vst [vmem:[#allocation2 + $0x139] sm:$0xff] %v283_v60  ;;  %v658_v10 = vadd.f32 %v626_v55, %v559_v50  ;;  %v462_v60 = vadd.f32 %v1849_v4, %v364_v13  ;;  %v431_v32 = vmul.f32 %v1733_v8, %v1742_v14  ;;  %v529_v55 = vmul.f32 %v1735_v9, %v1904_v29 }
  0x7b   : > { %317 = vst [vmem:[#allocation2 + $0x141] sm:$0xff] %v284_v38  ;;  %v1050_v2 = vadd.f32 %v1805_v47, %v952_v45  ;;  %v290_v38 = vld [vmem:[%s1717_s15 + $0xf8] sm:$0xff]  ;;  %v953_v46 = vadd.f32 %v921_v34, %v853_v48  ;;  %v1147_v47 = vadd.f32 %v1899_v59, %v1049_v22  ;;  %v628_v14 = vmul.f32 %v1757_v23, %v1943_v0 }
  0x7c   : > { %318 = vst [vmem:[#allocation2 + $0x151] sm:$0xff] %v285_v11  ;;  %v756_v4 = vadd.f32 %v1837_v62, %v658_v10  ;;  %v560_v16 = vadd.f32 %v528_v41, %v462_v60  ;;  %v463_v50 = vadd.f32 %v431_v32, %v365_v43  ;;  %v726_v22 = vmul.f32 %v1750_v19, %v1755_v21  ;;  %v889_v60 = vld [vmem:[#allocation2 + $0x80] sm:$0xff]  ;;  %v890_v43 = vld [vmem:[#allocation2 + $0x90] sm:$0xff] }
  0x7d   : > { %319 = vst [vmem:[#allocation2 + $0x159] sm:$0xff] %v286_v40  ;;  %v1051_v34 = vadd.f32 %v1823_v54, %v953_v46  ;;  %v1148_v13 = vadd.f32 %v1116_v20, %v1050_v2  ;;  %v366_v39 = vmul.f32 %v1731_v5, %v1912_v7  ;;  %v432_v20 = vmul.f32 %v1733_v8, %v1748_v18 }
  0x7e   : > { %320 = vst [vmem:[#allocation2 + $0x169] sm:$0xff] %v287_v52  ;;  %v854_v62 = vadd.f32 %v822_v1, %v756_v4  ;;  %v659_v11 = vadd.f32 %v627_v57, %v560_v16  ;;  %v561_v29 = vadd.f32 %v529_v55, %v463_v50  ;;  %v923_v45 = vmul.f32 %v1814_v51, %v888_v24 }
  0x7f   : > { %321 = vst [vmem:[#allocation2 + $0x171] sm:$0xff] %v288_v53  ;;  %v1149_v54 = vadd.f32 %v1117_v37, %v1051_v34  ;;  %v1021_v10 = vmul.f32 %v1764_v27, %v1761_v25  ;;  %v464_v41 = vadd.f32 %v432_v20, %v366_v39  ;;  %v530_v7 = vmul.f32 %v1735_v9, %v1922_v17  ;;  %v891_v20 = vld [vmem:[#allocation2 + $0x98] sm:$0xff] }
  0x80   : > { %322 = vst [vmem:[#allocation2 + $0x181] sm:$0xff] %v289_v15  ;;  %v954_v40 = vadd.f32 %v922_v61, %v854_v62  ;;  %v757_v59 = vadd.f32 %v1853_v6, %v659_v11  ;;  %v660_v37 = vadd.f32 %v628_v14, %v561_v29  ;;  %v629_v48 = vmul.f32 %v1757_v23, %v888_v24  ;;  %v1087_v62 = vld [vmem:[#allocation2 + $0x92] sm:$0xff] }
  0x81   : > { %323 = vst [vmem:[#allocation2 + $0x189] sm:$0xff] %v290_v38  ;;  %v562_v57 = vadd.f32 %v530_v7, %v464_v41  ;;  %v727_v15 = vmul.f32 %v1750_v19, %v1761_v25  ;;  %v367_v2 = vmul.f32 %v1731_v5, %v1943_v0  ;;  %v924_v16 = vmul.f32 %v1814_v51, %v889_v60 }
  0x82   : > { %1177 = vst [vmem:[%s1981_s17] sm:$0xff] %v1145_v26  ;;  %v1052_v6 = vadd.f32 %v1845_v3, %v954_v40  ;;  %v855_v52 = vadd.f32 %v823_v12, %v757_v59  ;;  %v1085_v26 = vld [vmem:[#allocation2 + $0x7a] sm:$0xff]  ;;  %v824_v3 = vmul.f32 %v1800_v44, %v1945_v42  ;;  %v758_v1 = vadd.f32 %v726_v22, %v660_v37 }
  0x83   : > { %1178 = vst [vmem:[%s1981_s17 + $0x8] sm:$0xff] %v1146_v31  ;;  %v1086_v31 = vld [vmem:[#allocation2 + $0x82] sm:$0xff]  ;;  %v1119_v4 = vmul.f32 %v1832_v58, %v1085_v26  ;;  %v433_v38 = vmul.f32 %v1733_v8, %v1755_v21  ;;  %v1022_v61 = vmul.f32 %v1764_v27, %v1770_v30  ;;  %v661_v32 = vadd.f32 %v629_v48, %v562_v57 }
  0x84   : > { %1179 = vst [vmem:[%s1981_s17 + $0x10] sm:$0xff] %v1147_v47  ;;  %v1150_v18 = vadd.f32 %v1118_v33, %v1052_v6  ;;  %v955_v53 = vadd.f32 %v923_v45, %v855_v52  ;;  %v856_v46 = vadd.f32 %v824_v3, %v758_v1  ;;  %v1120_v33 = vmul.f32 %v1832_v58, %v1086_v31 }
  0x85   : > { %1180 = vst [vmem:[%s1981_s17 + $0x18] sm:$0xff] %v1148_v13  ;;  %v825_v0 = vmul.f32 %v1800_v44, %v1085_v26  ;;  %v465_v11 = vadd.f32 %v433_v38, %v367_v2  ;;  %v531_v12 = vmul.f32 %v1735_v9, %v1945_v42  ;;  %v759_v50 = vadd.f32 %v727_v15, %v661_v32  ;;  %v892_v2 = vld [vmem:[#allocation2 + $0xa8] sm:$0xff] }
  0x86   : > { %1181 = vst [vmem:[%s1981_s17 + $0x20] sm:$0xff] %v1149_v54  ;;  %v1053_v17 = vadd.f32 %v1021_v10, %v955_v53  ;;  %v956_v34 = vadd.f32 %v924_v16, %v856_v46  ;;  %v925_v55 = vmul.f32 %v1814_v51, %v890_v43  ;;  %v368_v21 = vmul.f32 %v1731_v5, %v888_v24 }
  0x87   : > { %1182 = vst [vmem:[%s1981_s17 + $0x28] sm:$0xff] %v1150_v18  ;;  %v563_v14 = vadd.f32 %v531_v12, %v465_v11  ;;  %v630_v13 = vmul.f32 %v1757_v23, %v889_v60  ;;  %v728_v40 = vmul.f32 %v1750_v19, %v1770_v30  ;;  %v434_v59 = vmul.f32 %v1733_v8, %v1761_v25 }
  0x88   : > { %v1151_v47 = vadd.f32 %v1119_v4, %v1053_v17  ;;  %v1054_v22 = vadd.f32 %v1022_v61, %v956_v34  ;;  %v857_v54 = vadd.f32 %v825_v0, %v759_v50  ;;  %v1023_v42 = vmul.f32 %v1764_v27, %v1783_v35 }
  0x89   : > { %v1121_v29 = vmul.f32 %v1832_v58, %v1087_v62  ;;  %v662_v39 = vadd.f32 %v630_v13, %v563_v14  ;;  %v826_v24 = vmul.f32 %v1800_v44, %v1086_v31  ;;  %v466_v6 = vadd.f32 %v434_v59, %v368_v21  ;;  %v893_v21 = vld [vmem:[#allocation2 + $0xb0] sm:$0xff] }
  0x8a   : > { %1183 = vst [vmem:[%s1981_s17 + $0x30] sm:$0xff] %v1151_v47  ;;  %v532_v52 = vmul.f32 %v1735_v9, %v1085_v26  ;;  %v1152_v45 = vadd.f32 %v1120_v33, %v1054_v22  ;;  %v957_v10 = vadd.f32 %v925_v55, %v857_v54  ;;  %v631_v37 = vmul.f32 %v1757_v23, %v890_v43  ;;  %v1089_v55 = vld [vmem:[#allocation2 + $0xaa] sm:$0xff] }
  0x8b   : > { %v369_v25 = vmul.f32 %v1731_v5, %v889_v60  ;;  %v760_v41 = vadd.f32 %v728_v40, %v662_v39  ;;  %v729_v18 = vmul.f32 %v1750_v19, %v1783_v35  ;;  %v435_v53 = vmul.f32 %v1733_v8, %v1770_v30  ;;  %v1088_v60 = vld [vmem:[#allocation2 + $0x9a] sm:$0xff] }
  0x8c   : > { %v564_v7 = vadd.f32 %v532_v52, %v466_v6  ;;  %1184 = vst [vmem:[%s1981_s17 + $0x38] sm:$0xff] %v1152_v45  ;;  %v1055_v3 = vadd.f32 %v1023_v42, %v957_v10  ;;  %v926_v48 = vmul.f32 %v1814_v51, %v891_v20  ;;  %v1024_v26 = vmul.f32 %v1764_v27, %v1786_v36  ;;  %v894_v39 = vld [vmem:[#allocation2 + $0xc0] sm:$0xff] }
  0x8d   : > { %v827_v1 = vmul.f32 %v1800_v44, %v1087_v62  ;;  %v858_v57 = vadd.f32 %v826_v24, %v760_v41  ;;  %v467_v17 = vadd.f32 %v435_v53, %v369_v25  ;;  %v533_v4 = vmul.f32 %v1735_v9, %v1086_v31 }
  0x8e   : > { %v663_v15 = vadd.f32 %v631_v37, %v564_v7  ;;  %v1153_v16 = vadd.f32 %v1121_v29, %v1055_v3  ;;  %v632_v30 = vmul.f32 %v1757_v23, %v891_v20  ;;  %v730_v38 = vmul.f32 %v1750_v19, %v1786_v36 }
  0x8f   : > { %v370_v46 = vmul.f32 %v1731_v5, %v890_v43  ;;  %v958_v61 = vadd.f32 %v926_v48, %v858_v57  ;;  %v565_v32 = vadd.f32 %v533_v4, %v467_v17  ;;  %v436_v47 = vmul.f32 %v1733_v8, %v1783_v35  ;;  %v1090_v35 = vld [vmem:[#allocation2 + $0xb2] sm:$0xff] }
  0x90   : > { %v761_v33 = vadd.f32 %v729_v18, %v663_v15  ;;  %1185 = vst [vmem:[%s1981_s17 + $0x40] sm:$0xff] %v1153_v16  ;;  %v1122_v0 = vmul.f32 %v1832_v58, %v1088_v60  ;;  %v927_v11 = vmul.f32 %v1814_v51, %v892_v2  ;;  %v1025_v31 = vmul.f32 %v1764_v27, %v1812_v49  ;;  %v1091_v18 = vld [vmem:[#allocation2 + $0xc2] sm:$0xff] }
  0x91   : > { %v534_v12 = vmul.f32 %v1735_v9, %v1087_v62  ;;  %v1056_v34 = vadd.f32 %v1024_v26, %v958_v61  ;;  %v664_v43 = vadd.f32 %v632_v30, %v565_v32  ;;  %v468_v14 = vadd.f32 %v436_v47, %v370_v46  ;;  %v895_v61 = vld [vmem:[#allocation2 + $0xc8] sm:$0xff] }
  0x92   : > { %v859_v50 = vadd.f32 %v827_v1, %v761_v33  ;;  %v828_v13 = vmul.f32 %v1800_v44, %v1088_v60  ;;  %v633_v40 = vmul.f32 %v1757_v23, %v892_v2  ;;  %v731_v59 = vmul.f32 %v1750_v19, %v1812_v49 }
  0x93   : > { %v371_v22 = vmul.f32 %v1731_v5, %v891_v20  ;;  %v1154_v54 = vadd.f32 %v1122_v0, %v1056_v34  ;;  %v762_v62 = vadd.f32 %v730_v38, %v664_v43  ;;  %v566_v29 = vadd.f32 %v534_v12, %v468_v14 }
  0x94   : > { %v959_v42 = vadd.f32 %v927_v11, %v859_v50  ;;  %v1123_v24 = vmul.f32 %v1832_v58, %v1089_v55  ;;  %v928_v6 = vmul.f32 %v1814_v51, %v893_v21  ;;  %v1026_v52 = vmul.f32 %v1764_v27, %v1830_v56 }
  0x95   : > { %v437_v45 = vmul.f32 %v1733_v8, %v1786_v36  ;;  %1186 = vst [vmem:[%s1981_s17 + $0x48] sm:$0xff] %v1154_v54  ;;  %v860_v37 = vadd.f32 %v828_v13, %v762_v62  ;;  %v1124_v20 = vmul.f32 %v1832_v58, %v1090_v35  ;;  %v665_v25 = vadd.f32 %v633_v40, %v566_v29  ;;  %v2347_v13 = vld [vmem:[#allocation12_spill] sm:$0xff] }
  0x96   : > { %v1057_v10 = vadd.f32 %v1025_v31, %v959_v42  ;;  %v829_v41 = vmul.f32 %v1800_v44, %v1089_v55  ;;  %v929_v7 = vmul.f32 %v1814_v51, %v894_v39  ;;  %v535_v3 = vmul.f32 %v1735_v9, %v1088_v60  ;;  %v896_v54 = vld [vmem:[#allocation2 + $0xd8] sm:$0xff] }
  0x97   : > { %v469_v53 = vadd.f32 %v437_v45, %v371_v22  ;;  %v960_v26 = vadd.f32 %v928_v6, %v860_v37  ;;  %v763_v1 = vadd.f32 %v731_v59, %v665_v25  ;;  %v372_v36 = vmul.f32 %v1731_v5, %v892_v2 }
  0x98   : > { %v1155_v48 = vadd.f32 %v1123_v24, %v1057_v10  ;;  %v634_v15 = vmul.f32 %v1757_v23, %v893_v21  ;;  %v732_v17 = vmul.f32 %v1750_v19, %v1830_v56  ;;  %v438_v4 = vmul.f32 %v1733_v8, %v1812_v49 }
  0x99   : > { %v567_v57 = vadd.f32 %v535_v3, %v469_v53  ;;  %v1058_v16 = vadd.f32 %v1026_v52, %v960_v26  ;;  %v861_v30 = vadd.f32 %v829_v41, %v763_v1  ;;  %v1027_v60 = vmul.f32 %v1764_v27, %v1841_v63  ;;  %v897_v26 = vld [vmem:[#allocation2 + $0xe0] sm:$0xff] }
  0x9a   : > { %1187 = vst [vmem:[%s1981_s17 + $0x50] sm:$0xff] %v1155_v48  ;;  %v1125_v38 = vmul.f32 %v1832_v58, %v1091_v18  ;;  %v830_v2 = vmul.f32 %v1800_v44, %v1090_v35  ;;  %v470_v33 = vadd.f32 %v438_v4, %v372_v36  ;;  %v536_v32 = vmul.f32 %v1735_v9, %v1089_v55  ;;  %v1093_v48 = vld [vmem:[#allocation2 + $0xda] sm:$0xff]  ;;  %v407_v36 = vld [vmem:[#allocation2 + $0xc9] sm:$0xff] }
  0x9b   : > { %v666_v46 = vadd.f32 %v634_v15, %v567_v57  ;;  %v1156_v47 = vadd.f32 %v1124_v20, %v1058_v16  ;;  %v961_v0 = vadd.f32 %v929_v7, %v861_v30  ;;  %v635_v49 = vmul.f32 %v1757_v23, %v894_v39  ;;  %v1094_v30 = vld [vmem:[#allocation2 + $0xe2] sm:$0xff] }
  0x9c   : > { %v373_v11 = vmul.f32 %v1731_v5, %v893_v21  ;;  %v568_v12 = vadd.f32 %v536_v32, %v470_v33  ;;  %v733_v34 = vmul.f32 %v1750_v19, %v1841_v63  ;;  %v439_v50 = vmul.f32 %v1733_v8, %v1830_v56  ;;  %v1092_v21 = vld [vmem:[#allocation2 + $0xca] sm:$0xff] }
  0x9d   : > { %v764_v31 = vadd.f32 %v732_v17, %v666_v46  ;;  %1188 = vst [vmem:[%s1981_s17 + $0x58] sm:$0xff] %v1156_v47  ;;  %v1059_v43 = vadd.f32 %v1027_v60, %v961_v0  ;;  %v930_v14 = vmul.f32 %v1814_v51, %v895_v61  ;;  %v1028_v55 = vmul.f32 %v1764_v27, %v2347_v13  ;;  %v2349_v47 = vld [vmem:[#allocation14_spill] sm:$0xff] }
  0x9e   : > { %v831_v40 = vmul.f32 %v1800_v44, %v1091_v18  ;;  %v667_v22 = vadd.f32 %v635_v49, %v568_v12  ;;  %v471_v42 = vadd.f32 %v439_v50, %v373_v11  ;;  %v537_v62 = vmul.f32 %v1735_v9, %v1090_v35  ;;  %v2348_v35 = vld [vmem:[#allocation13_spill] sm:$0xff]  ;;  %v898_v11 = vld [vmem:[#allocation2 + $0xf0] sm:$0xff] }
  0x9f   : > { %v862_v59 = vadd.f32 %v830_v2, %v764_v31  ;;  %v1157_v29 = vadd.f32 %v1125_v38, %v1059_v43  ;;  %v636_v56 = vmul.f32 %v1757_v23, %v895_v61  ;;  %v734_v24 = vmul.f32 %v1750_v19, %v2347_v13 }
  0xa0   : > { %v374_v6 = vmul.f32 %v1731_v5, %v894_v39  ;;  %v765_v45 = vadd.f32 %v733_v34, %v667_v22  ;;  %v569_v10 = vadd.f32 %v537_v62, %v471_v42  ;;  %v440_v37 = vmul.f32 %v1733_v8, %v1841_v63  ;;  %v1095_v34 = vld [vmem:[#allocation2 + $0xf2] sm:$0xff] }
  0xa1   : > { %v962_v52 = vadd.f32 %v930_v14, %v862_v59  ;;  %1189 = vst [vmem:[%s1981_s17 + $0x60] sm:$0xff] %v1157_v29  ;;  %v1126_v20 = vmul.f32 %v1832_v58, %v1092_v21  ;;  %v931_v25 = vmul.f32 %v1814_v51, %v896_v54  ;;  %v1029_v41 = vmul.f32 %v1764_v27, %v2348_v35 }
  0xa2   : > { %v538_v7 = vmul.f32 %v1735_v9, %v1091_v18  ;;  %v863_v3 = vadd.f32 %v831_v40, %v765_v45  ;;  %v668_v39 = vadd.f32 %v636_v56, %v569_v10  ;;  %v472_v1 = vadd.f32 %v440_v37, %v374_v6  ;;  %v702_v40 = vld [vmem:[#allocation2 + $0xe1] sm:$0xff]  ;;  %v998_v10 = vld [vmem:[#allocation2 + $0xf9] sm:$0xff] }
  0xa3   : > { %v1060_v53 = vadd.f32 %v1028_v55, %v962_v52  ;;  %v832_v63 = vmul.f32 %v1800_v44, %v1092_v21  ;;  %v637_v57 = vmul.f32 %v1757_v23, %v896_v54  ;;  %v735_v15 = vmul.f32 %v1750_v19, %v2348_v35 }
  0xa4   : > { %v375_v17 = vmul.f32 %v1731_v5, %v895_v61  ;;  %v963_v16 = vadd.f32 %v931_v25, %v863_v3  ;;  %v766_v18 = vadd.f32 %v734_v24, %v668_v39  ;;  %v570_v60 = vadd.f32 %v538_v7, %v472_v1  ;;  %v408_v61 = vld [vmem:[#allocation2 + $0xd9] sm:$0xff]  ;;  %v703_v25 = vld [vmem:[#allocation2 + $0xf1] sm:$0xff] }
  0xa5   : > { %v1158_v4 = vadd.f32 %v1126_v20, %v1060_v53  ;;  %v1127_v38 = vmul.f32 %v1832_v58, %v1093_v48  ;;  %v932_v46 = vmul.f32 %v1814_v51, %v897_v26  ;;  %v441_v2 = vmul.f32 %v1733_v8, %v407_v36 }
  0xa6   : > { %v1061_v33 = vadd.f32 %v1029_v41, %v963_v16  ;;  %v864_v32 = vadd.f32 %v832_v63, %v766_v18  ;;  %v1030_v0 = vmul.f32 %v1764_v27, %v2349_v47  ;;  %v669_v49 = vadd.f32 %v637_v57, %v570_v60  ;;  %v900_v16 = vld [vmem:[#allocation2 + $0x108] sm:$0xff] }
  0xa7   : > { %1190 = vst [vmem:[%s1981_s17 + $0x68] sm:$0xff] %v1158_v4  ;;  %v1128_v31 = vmul.f32 %v1832_v58, %v1094_v30  ;;  %v833_v12 = vmul.f32 %v1800_v44, %v1093_v48  ;;  %v473_v50 = vadd.f32 %v441_v2, %v375_v17  ;;  %v539_v43 = vmul.f32 %v1735_v9, %v1092_v21  ;;  %v1096_v17 = vld [vmem:[#allocation2 + $0xfa] sm:$0xff]  ;;  %v999_v47 = vld [vmem:[#allocation2 + $0x109] sm:$0xff] }
  0xa8   : > { %v1159_v14 = vadd.f32 %v1127_v38, %v1061_v33  ;;  %v964_v13 = vadd.f32 %v932_v46, %v864_v32  ;;  %v767_v55 = vadd.f32 %v735_v15, %v669_v49  ;;  %v376_v59 = vmul.f32 %v1731_v5, %v896_v54  ;;  %v899_v54 = vld [vmem:[#allocation2 + $0xf8] sm:$0xff] }
  0xa9   : > { %v933_v22 = vmul.f32 %v1814_v51, %v898_v11  ;;  %v571_v42 = vadd.f32 %v539_v43, %v473_v50  ;;  %v638_v62 = vmul.f32 %v1757_v23, %v897_v26  ;;  %v442_v29 = vmul.f32 %v1733_v8, %v408_v61 }
  0xaa   : > { %1191 = vst [vmem:[%s1981_s17 + $0x70] sm:$0xff] %v1159_v14  ;;  %v1062_v56 = vadd.f32 %v1030_v0, %v964_v13  ;;  %v865_v24 = vadd.f32 %v833_v12, %v767_v55  ;;  %v1031_v6 = vmul.f32 %v1764_v27, %v1880_v28  ;;  %v1129_v21 = vmul.f32 %v1832_v58, %v1095_v34  ;;  %v1097_v14 = vld [vmem:[#allocation2 + $0x10a] sm:$0xff] }
  0xab   : > { %v670_v52 = vadd.f32 %v638_v62, %v571_v42  ;;  %v736_v45 = vmul.f32 %v1750_v19, %v702_v40  ;;  %v474_v37 = vadd.f32 %v442_v29, %v376_v59  ;;  %v540_v20 = vmul.f32 %v1735_v9, %v1093_v48  ;;  %v1000_v55 = vld [vmem:[#allocation2 + $0x111] sm:$0xff] }
  0xac   : > { %v1160_v35 = vadd.f32 %v1128_v31, %v1062_v56  ;;  %v965_v41 = vadd.f32 %v933_v22, %v865_v24  ;;  %v834_v7 = vmul.f32 %v1800_v44, %v1094_v30  ;;  %v377_v53 = vmul.f32 %v1731_v5, %v897_v26 }
  0xad   : > { %v768_v3 = vadd.f32 %v736_v45, %v670_v52  ;;  %v572_v28 = vadd.f32 %v540_v20, %v474_v37  ;;  %v639_v39 = vmul.f32 %v1757_v23, %v898_v11  ;;  %v443_v1 = vmul.f32 %v1733_v8, %v702_v40 }
  0xae   : > { %1192 = vst [vmem:[%s1981_s17 + $0x78] sm:$0xff] %v1160_v35  ;;  %v1063_v36 = vadd.f32 %v1031_v6, %v965_v41  ;;  %v934_v63 = vmul.f32 %v1814_v51, %v899_v54  ;;  %v1032_v57 = vmul.f32 %v1764_v27, %v998_v10  ;;  %v737_v48 = vmul.f32 %v1750_v19, %v703_v25 }
  0xaf   : > { %v866_v15 = vadd.f32 %v834_v7, %v768_v3  ;;  %v671_v4 = vadd.f32 %v639_v39, %v572_v28  ;;  %v475_v26 = vadd.f32 %v443_v1, %v377_v53  ;;  %v541_v18 = vmul.f32 %v1735_v9, %v1094_v30  ;;  %v1001_v3 = vld [vmem:[#allocation2 + $0x121] sm:$0xff] }
  0xb0   : > { %v1161_v60 = vadd.f32 %v1129_v21, %v1063_v36  ;;  %v835_v38 = vmul.f32 %v1800_v44, %v1095_v34  ;;  %v640_v46 = vmul.f32 %v1757_v23, %v899_v54  ;;  %v378_v2 = vmul.f32 %v1731_v5, %v898_v11  ;;  %v901_v11 = vld [vmem:[#allocation2 + $0x110] sm:$0xff]  ;;  %v1099_v28 = vld [vmem:[#allocation2 + $0x122] sm:$0xff] }
  0xb1   : > { %v966_v33 = vadd.f32 %v934_v63, %v866_v15  ;;  %v769_v32 = vadd.f32 %v737_v48, %v671_v4  ;;  %v573_v0 = vadd.f32 %v541_v18, %v475_v26  ;;  %v444_v49 = vmul.f32 %v1733_v8, %v703_v25 }
  0xb2   : > { %1193 = vst [vmem:[%s1981_s17 + $0x80] sm:$0xff] %v1161_v60  ;;  %v1130_v61 = vmul.f32 %v1832_v58, %v1096_v17  ;;  %v935_v31 = vmul.f32 %v1814_v51, %v900_v16  ;;  %v738_v30 = vmul.f32 %v1750_v19, %v998_v10  ;;  %v542_v12 = vmul.f32 %v1735_v9, %v1095_v34  ;;  %v1098_v34 = vld [vmem:[#allocation2 + $0x112] sm:$0xff] }
  0xb3   : > { %v1064_v50 = vadd.f32 %v1032_v57, %v966_v33  ;;  %v867_v43 = vadd.f32 %v835_v38, %v769_v32  ;;  %v672_v13 = vadd.f32 %v640_v46, %v573_v0  ;;  %v476_v40 = vadd.f32 %v444_v49, %v378_v2  ;;  %v903_v33 = vld [vmem:[#allocation2 + $0x128] sm:$0xff] }
  0xb4   : > { %v1033_v59 = vmul.f32 %v1764_v27, %v999_v47  ;;  %v836_v22 = vmul.f32 %v1800_v44, %v1096_v17  ;;  %v641_v42 = vmul.f32 %v1757_v23, %v900_v16  ;;  %v379_v62 = vmul.f32 %v1731_v5, %v899_v54  ;;  %v902_v54 = vld [vmem:[#allocation2 + $0x120] sm:$0xff] }
  0xb5   : > { %v1162_v29 = vadd.f32 %v1130_v61, %v1064_v50  ;;  %v967_v56 = vadd.f32 %v935_v31, %v867_v43  ;;  %v770_v24 = vadd.f32 %v738_v30, %v672_v13  ;;  %v574_v6 = vadd.f32 %v542_v12, %v476_v40  ;;  %v2174_v50 = vld [vmem:[#allocation6 + $0x1] ss:$0 sm:$0xff] }
  0xb6   : > { %v1131_v21 = vmul.f32 %v1832_v58, %v1097_v14  ;;  %v936_v52 = vmul.f32 %v1814_v51, %v901_v11  ;;  %v1034_v45 = vmul.f32 %v1764_v27, %v1000_v55  ;;  %v445_v37 = vmul.f32 %v1733_v8, %v998_v10 }
  0xb7   : > { %1194 = vst [vmem:[%s1981_s17 + $0x88] sm:$0xff] %v1162_v29  ;;  %v1065_v20 = vadd.f32 %v1033_v59, %v967_v56  ;;  %v868_v25 = vadd.f32 %v836_v22, %v770_v24  ;;  %v673_v35 = vadd.f32 %v641_v42, %v574_v6  ;;  %v739_v41 = vmul.f32 %v1750_v19, %v999_v47  ;;  %v1100_v22 = vld [vmem:[#allocation2 + $0x12a] sm:$0xff]  ;;  %v904_v42 = vld [vmem:[#allocation2 + $0x138] sm:$0xff]  ;;  %v2181_v29 = vld [vmem:[#allocation6 + $0x2] ss:$0 sm:$0xff] }
  0xb8   : > { %v1132_v7 = vmul.f32 %v1832_v58, %v1098_v34  ;;  %v837_v53 = vmul.f32 %v1800_v44, %v1097_v14  ;;  %v477_v39 = vadd.f32 %v445_v37, %v379_v62  ;;  %v543_v1 = vmul.f32 %v1735_v9, %v1096_v17 }
  0xb9   : > { %v1163_v36 = vadd.f32 %v1131_v21, %v1065_v20  ;;  %v968_v63 = vadd.f32 %v936_v52, %v868_v25  ;;  %v771_v10 = vadd.f32 %v739_v41, %v673_v35  ;;  %v380_v57 = vmul.f32 %v1731_v5, %v900_v16  ;;  %v1002_v5 = vld [vmem:[#allocation2 + $0x129] sm:$0xff]  ;;  %v2191_v35 = vld [vmem:[#allocation6 + $0x5] ss:$0 sm:$0xff] }
  0xba   : > { %v937_v48 = vmul.f32 %v1814_v51, %v902_v54  ;;  %v575_v15 = vadd.f32 %v543_v1, %v477_v39  ;;  %v642_v4 = vmul.f32 %v1757_v23, %v901_v11  ;;  %v446_v26 = vmul.f32 %v1733_v8, %v999_v47  ;;  %v2170_v47 = vld [vmem:[#allocation6] ss:$0 sm:$0xff]  ;;  %v905_v39 = vld [vmem:[#allocation2 + $0x140] sm:$0xff] }
  0xbb   : > { %1195 = vst [vmem:[%s1981_s17 + $0x90] sm:$0xff] %v1163_v36  ;;  %v1066_v18 = vadd.f32 %v1034_v45, %v968_v63  ;;  %v869_v60 = vadd.f32 %v837_v53, %v771_v10  ;;  %v1035_v38 = vmul.f32 %v1764_v27, %v1001_v3  ;;  %v1133_v46 = vmul.f32 %v1832_v58, %v1099_v28  ;;  %v1004_v1 = vld [vmem:[#allocation2 + $0x141] sm:$0xff] }
  0xbc   : > { %v674_v17 = vadd.f32 %v642_v4, %v575_v15  ;;  %v740_v2 = vmul.f32 %v1750_v19, %v1000_v55  ;;  %v478_v16 = vadd.f32 %v446_v26, %v380_v57  ;;  %v544_v32 = vmul.f32 %v1735_v9, %v1097_v14  ;;  %v2199_v57 = vld [vmem:[#allocation6 + $0x4] ss:$0 sm:$0xff] }
  0xbd   : > { %v1164_v0 = vadd.f32 %v1132_v7, %v1066_v18  ;;  %v969_v49 = vadd.f32 %v937_v48, %v869_v60  ;;  %v838_v8 = vmul.f32 %v1800_v44, %v1098_v34  ;;  %v381_v61 = vmul.f32 %v2170_v47, %v901_v11  ;;  %v1102_v18 = vld [vmem:[#allocation2 + $0x142] sm:$0xff] }
  0xbe   : > { %v772_v31 = vadd.f32 %v740_v2, %v674_v17  ;;  %v576_v30 = vadd.f32 %v544_v32, %v478_v16  ;;  %v643_v12 = vmul.f32 %v1757_v23, %v902_v54  ;;  %v447_v43 = vmul.f32 %v2174_v50, %v1000_v55 }
  0xbf   : > { %1196 = vst [vmem:[%s1981_s17 + $0x98] sm:$0xff] %v1164_v0  ;;  %v1067_v13 = vadd.f32 %v1035_v38, %v969_v49  ;;  %v938_v9 = vmul.f32 %v1814_v51, %v903_v33  ;;  %v1036_v14 = vmul.f32 %v1764_v27, %v1002_v5  ;;  %v741_v40 = vmul.f32 %v1750_v19, %v1001_v3  ;;  %v1003_v19 = vld [vmem:[#allocation2 + $0x139] sm:$0xff] }
  0xc0   : > { %v870_v59 = vadd.f32 %v838_v8, %v772_v31  ;;  %v675_v11 = vadd.f32 %v643_v12, %v576_v30  ;;  %v479_v62 = vadd.f32 %v447_v43, %v381_v61  ;;  %v545_v56 = vmul.f32 %v2181_v29, %v1098_v34  ;;  %v2210_v8 = vld [vmem:[#allocation6 + $0x6] ss:$0 sm:$0xff] }
  0xc1   : > { %v1165_v24 = vadd.f32 %v1133_v46, %v1067_v13  ;;  %v839_v55 = vmul.f32 %v1800_v44, %v1099_v28  ;;  %v644_v6 = vmul.f32 %v1757_v23, %v903_v33  ;;  %v382_v21 = vmul.f32 %v2170_v47, %v902_v54  ;;  %v1101_v54 = vld [vmem:[#allocation2 + $0x13a] sm:$0xff]  ;;  %v1005_v31 = vld [vmem:[#allocation2 + $0x151] sm:$0xff] }
  0xc2   : > { %v970_v27 = vadd.f32 %v938_v9, %v870_v59  ;;  %v773_v52 = vadd.f32 %v741_v40, %v675_v11  ;;  %v577_v45 = vadd.f32 %v545_v56, %v479_v62  ;;  %v448_v37 = vmul.f32 %v2174_v50, %v1001_v3  ;;  %v2195_v3 = vld [vmem:[#allocation6 + $0x9] ss:$0 sm:$0xff] }
  0xc3   : > { %1197 = vst [vmem:[%s1981_s17 + $0xa0] sm:$0xff] %v1165_v24  ;;  %v1134_v20 = vmul.f32 %v1832_v58, %v1100_v22  ;;  %v939_v25 = vmul.f32 %v1814_v51, %v904_v42  ;;  %v742_v34 = vmul.f32 %v2191_v35, %v1002_v5  ;;  %v546_v41 = vmul.f32 %v2181_v29, %v1099_v28 }
  0xc4   : > { %v1068_v23 = vadd.f32 %v1036_v14, %v970_v27  ;;  %v871_v7 = vadd.f32 %v839_v55, %v773_v52  ;;  %v676_v53 = vadd.f32 %v644_v6, %v577_v45  ;;  %v480_v36 = vadd.f32 %v448_v37, %v382_v21  ;;  %v2215_v14 = vld [vmem:[#allocation6 + $0x8] ss:$0 sm:$0xff]  ;;  %v1006_v27 = vld [vmem:[#allocation2 + $0x159] sm:$0xff] }
  0xc5   : > { %v1037_v63 = vmul.f32 %v2195_v3, %v1003_v19  ;;  %v840_v10 = vmul.f32 %v1800_v44, %v1100_v22  ;;  %v645_v48 = vmul.f32 %v2199_v57, %v904_v42  ;;  %v383_v28 = vmul.f32 %v2170_v47, %v903_v33  ;;  %v906_v33 = vld [vmem:[#allocation2 + $0x150] sm:$0xff]  ;;  %v907_v21 = vld [vmem:[#allocation2 + $0x158] sm:$0xff] }
  0xc6   : > { %v1166_v15 = vadd.f32 %v1134_v20, %v1068_v23  ;;  %v971_v4 = vadd.f32 %v939_v25, %v871_v7  ;;  %v774_v26 = vadd.f32 %v742_v34, %v676_v53  ;;  %v578_v60 = vadd.f32 %v546_v41, %v480_v36 }
  0xc7   : > { %v1135_v38 = vmul.f32 %v1832_v58, %v1101_v54  ;;  %v940_v46 = vmul.f32 %v1814_v51, %v905_v39  ;;  %v1038_v17 = vmul.f32 %v2195_v3, %v1004_v1  ;;  %v449_v2 = vmul.f32 %v2174_v50, %v1002_v5  ;;  %v1103_v51 = vld [vmem:[#allocation2 + $0x152] sm:$0xff] }
  0xc8   : > { %1198 = vst [vmem:[%s1981_s17 + $0xa8] sm:$0xff] %v1166_v15  ;;  %v1069_v44 = vadd.f32 %v1037_v63, %v971_v4  ;;  %v872_v16 = vadd.f32 %v840_v10, %v774_v26  ;;  %v677_v32 = vadd.f32 %v645_v48, %v578_v60  ;;  %v743_v0 = vmul.f32 %v2191_v35, %v1003_v19  ;;  %v1104_v48 = vld [vmem:[#allocation2 + $0x15a] sm:$0xff]  ;;  %v908_v15 = vld [vmem:[#allocation2 + $0x168] sm:$0xff] }
  0xc9   : > { %v1136_v49 = vmul.f32 %v1832_v58, %v1102_v18  ;;  %v841_v61 = vmul.f32 %v2210_v8, %v1101_v54  ;;  %v481_v30 = vadd.f32 %v449_v2, %v383_v28  ;;  %v547_v12 = vmul.f32 %v2181_v29, %v1100_v22  ;;  %v2222_v22 = vld [vmem:[#allocation6 + $0xa] ss:$0 sm:$0xff]  ;;  %v1007_v2 = vld [vmem:[#allocation2 + $0x169] sm:$0xff] }
  0xca   : > { %v1167_v5 = vadd.f32 %v1135_v38, %v1069_v44  ;;  %v972_v43 = vadd.f32 %v940_v46, %v872_v16  ;;  %v775_v13 = vadd.f32 %v743_v0, %v677_v32  ;;  %v384_v9 = vmul.f32 %v2170_v47, %v904_v42 }
  0xcb   : > { %v941_v40 = vmul.f32 %v2215_v14, %v906_v33  ;;  %v579_v58 = vadd.f32 %v547_v12, %v481_v30  ;;  %v646_v59 = vmul.f32 %v2199_v57, %v905_v39  ;;  %v450_v11 = vmul.f32 %v2174_v50, %v1003_v19  ;;  %v1105_v12 = vld [vmem:[#allocation2 + $0x16a] sm:$0xff] }
  0xcc   : > { %1199 = vst [vmem:[%s1981_s17 + $0xb0] sm:$0xff] %v1167_v5  ;;  %v1070_v62 = vadd.f32 %v1038_v17, %v972_v43  ;;  %v873_v56 = vadd.f32 %v841_v61, %v775_v13  ;;  %v1039_v24 = vmul.f32 %v2195_v3, %v1005_v31  ;;  %v1137_v55 = vmul.f32 %v2222_v22, %v1103_v51  ;;  %v1008_v43 = vld [vmem:[#allocation2 + $0x171] sm:$0xff] }
  0xcd   : > { %v678_v42 = vadd.f32 %v646_v59, %v579_v58  ;;  %v744_v6 = vmul.f32 %v2191_v35, %v1004_v1  ;;  %v482_v52 = vadd.f32 %v450_v11, %v384_v9  ;;  %v548_v45 = vmul.f32 %v2181_v29, %v1101_v54 }
  0xce   : > { %v1168_v37 = vadd.f32 %v1136_v49, %v1070_v62  ;;  %v973_v19 = vadd.f32 %v941_v40, %v873_v56  ;;  %v842_v20 = vmul.f32 %v2210_v8, %v1102_v18  ;;  %v385_v25 = vmul.f32 %v2170_v47, %v905_v39 }
  0xcf   : > { %v776_v34 = vadd.f32 %v744_v6, %v678_v42  ;;  %v580_v41 = vadd.f32 %v548_v45, %v482_v52  ;;  %v647_v23 = vmul.f32 %v2199_v57, %v906_v33  ;;  %v451_v7 = vmul.f32 %v2174_v50, %v1004_v1 }
  0xd0   : > { %1200 = vst [vmem:[%s1981_s17 + $0xb8] sm:$0xff] %v1168_v37  ;;  %v1071_v53 = vadd.f32 %v1039_v24, %v973_v19  ;;  %v942_v36 = vmul.f32 %v2215_v14, %v907_v21  ;;  %v1040_v63 = vmul.f32 %v2195_v3, %v1006_v27  ;;  %v745_v54 = vmul.f32 %v2191_v35, %v1005_v31 }
  0xd1   : > { %v874_v10 = vadd.f32 %v842_v20, %v776_v34  ;;  %v679_v28 = vadd.f32 %v647_v23, %v580_v41  ;;  %v483_v39 = vadd.f32 %v451_v7, %v385_v25  ;;  %v549_v4 = vmul.f32 %v2181_v29, %v1102_v18  ;;  %v1009_v34 = vld [vmem:[#allocation2 + $0x181] sm:$0xff] }
  0xd2   : > { %v1169_v26 = vadd.f32 %v1137_v55, %v1071_v53  ;;  %v843_v60 = vmul.f32 %v2210_v8, %v1103_v51  ;;  %v648_v1 = vmul.f32 %v2199_v57, %v907_v21  ;;  %v386_v38 = vmul.f32 %v2170_v47, %v906_v33  ;;  %v909_v33 = vld [vmem:[#allocation2 + $0x170] sm:$0xff] }
  0xd3   : > { %v974_v46 = vadd.f32 %v942_v36, %v874_v10  ;;  %v777_v17 = vadd.f32 %v745_v54, %v679_v28  ;;  %v581_v44 = vadd.f32 %v549_v4, %v483_v39  ;;  %v452_v16 = vmul.f32 %v2174_v50, %v1005_v31  ;;  %v1107_v54 = vld [vmem:[#allocation2 + $0x182] sm:$0xff] }
  0xd4   : > { %1201 = vst [vmem:[%s1981_s17 + $0xc0] sm:$0xff] %v1169_v26  ;;  %v1138_v32 = vmul.f32 %v2222_v22, %v1104_v48  ;;  %v943_v0 = vmul.f32 %v2215_v14, %v908_v15  ;;  %v746_v18 = vmul.f32 %v2191_v35, %v1006_v27  ;;  %v550_v49 = vmul.f32 %v2181_v29, %v1103_v51  ;;  %v1106_v51 = vld [vmem:[#allocation2 + $0x172] sm:$0xff] }
  0xd5   : > { %v1072_v61 = vadd.f32 %v1040_v63, %v974_v46  ;;  %v875_v30 = vadd.f32 %v843_v60, %v777_v17  ;;  %v680_v5 = vadd.f32 %v648_v1, %v581_v44  ;;  %v484_v13 = vadd.f32 %v452_v16, %v386_v38  ;;  %v911_v38 = vld [vmem:[#allocation2 + $0x188] sm:$0xff] }
  0xd6   : > { %v1041_v9 = vmul.f32 %v2195_v3, %v1007_v2  ;;  %v844_v31 = vmul.f32 %v2210_v8, %v1104_v48  ;;  %v649_v40 = vmul.f32 %v2199_v57, %v908_v15  ;;  %v387_v58 = vmul.f32 %v2170_v47, %v907_v21  ;;  %v910_v21 = vld [vmem:[#allocation2 + $0x180] sm:$0xff] }
  0xd7   : > { %v1170_v59 = vadd.f32 %v1138_v32, %v1072_v61  ;;  %v975_v11 = vadd.f32 %v943_v0, %v875_v30  ;;  %v778_v62 = vadd.f32 %v746_v18, %v680_v5  ;;  %v582_v56 = vadd.f32 %v550_v49, %v484_v13  ;;  %v1010_v49 = vld [vmem:[#allocation2 + $0x189] sm:$0xff] }
  0xd8   : > { %v1139_v24 = vmul.f32 %v2222_v22, %v1105_v12  ;;  %v944_v55 = vmul.f32 %v2215_v14, %v909_v33  ;;  %v1042_v42 = vmul.f32 %v2195_v3, %v1008_v43  ;;  %v453_v6 = vmul.f32 %v2174_v50, %v1006_v27 }
  0xd9   : > { %1202 = vst [vmem:[%s1981_s17 + $0xc8] sm:$0xff] %v1170_v59  ;;  %v1073_v52 = vadd.f32 %v1041_v9, %v975_v11  ;;  %v876_v45 = vadd.f32 %v844_v31, %v778_v62  ;;  %v681_v37 = vadd.f32 %v649_v40, %v582_v56  ;;  %v747_v19 = vmul.f32 %v2191_v35, %v1007_v2  ;;  %v1108_v40 = vld [vmem:[#allocation2 + $0x18a] sm:$0xff] }
  0xda   : > { %v1140_v20 = vmul.f32 %v2222_v22, %v1106_v51  ;;  %v845_v25 = vmul.f32 %v2210_v8, %v1105_v12  ;;  %v485_v41 = vadd.f32 %v453_v6, %v387_v58  ;;  %v551_v23 = vmul.f32 %v2181_v29, %v1104_v48 }
  0xdb   : > { %v1171_v7 = vadd.f32 %v1139_v24, %v1073_v52  ;;  %v976_v53 = vadd.f32 %v944_v55, %v876_v45  ;;  %v779_v36 = vadd.f32 %v747_v19, %v681_v37  ;;  %v388_v27 = vmul.f32 %v2170_v47, %v908_v15  ;;  %v1440_v24 = vld [vmem:[#allocation2] sm:$0xff] }
  0xdc   : > { %v945_v63 = vmul.f32 %v2215_v14, %v910_v21  ;;  %v583_v10 = vadd.f32 %v551_v23, %v485_v41  ;;  %v650_v28 = vmul.f32 %v2199_v57, %v909_v33  ;;  %v454_v39 = vmul.f32 %v2174_v50, %v1007_v2  ;;  %v1109_v37 = vld [vmem:[#allocation2 + $0x19a] sm:$0xff] }
  0xdd   : > { %1203 = vst [vmem:[%s1981_s17 + $0xd0] sm:$0xff] %v1171_v7  ;;  %v1074_v4 = vadd.f32 %v1042_v42, %v976_v53  ;;  %v877_v26 = vadd.f32 %v845_v25, %v779_v36  ;;  %v1043_v60 = vmul.f32 %v2195_v3, %v1009_v34  ;;  %v748_v48 = vmul.f32 %v2191_v35, %v1008_v43  ;;  %v1012_v19 = vld [vmem:[#allocation2 + $0x1a1] sm:$0xff] }
  0xde   : > { %v682_v1 = vadd.f32 %v650_v28, %v583_v10  ;;  %v486_v46 = vadd.f32 %v454_v39, %v388_v27  ;;  %v552_v15 = vmul.f32 %v2181_v29, %v1105_v12  ;;  %v651_v17 = vmul.f32 %v2199_v57, %v910_v21  ;;  %v1110_v7 = vld [vmem:[#allocation2 + $0x1a2] sm:$0xff] }
  0xdf   : > { %v1172_v44 = vadd.f32 %v1140_v20, %v1074_v4  ;;  %v977_v16 = vadd.f32 %v945_v63, %v877_v26  ;;  %v1141_v32 = vmul.f32 %v2222_v22, %v1107_v54  ;;  %v389_v2 = vmul.f32 %v2170_v47, %v909_v33  ;;  %v1011_v47 = vld [vmem:[#allocation2 + $0x199] sm:$0xff] }
  0xe0   : > { %v780_v0 = vadd.f32 %v748_v48, %v682_v1  ;;  %v846_v18 = vmul.f32 %v2210_v8, %v1106_v51  ;;  %v584_v61 = vadd.f32 %v552_v15, %v486_v46  ;;  %v455_v30 = vmul.f32 %v2174_v50, %v1008_v43 }
  0xe1   : > { %1204 = vst [vmem:[%s1981_s17 + $0xd8] sm:$0xff] %v1172_v44  ;;  %v1075_v5 = vadd.f32 %v1043_v60, %v977_v16  ;;  %v946_v13 = vmul.f32 %v2215_v14, %v911_v38  ;;  %v749_v12 = vmul.f32 %v2191_v35, %v1009_v34  ;;  %v553_v9 = vmul.f32 %v2181_v29, %v1106_v51 }
  0xe2   : > { %v878_v31 = vadd.f32 %v846_v18, %v780_v0  ;;  %v683_v58 = vadd.f32 %v651_v17, %v584_v61  ;;  %v487_v33 = vadd.f32 %v455_v30, %v389_v2  ;;  %v652_v59 = vmul.f32 %v2199_v57, %v911_v38 }
  0xe3   : > { %v1173_v11 = vadd.f32 %v1141_v32, %v1075_v5  ;;  %v1044_v50 = vmul.f32 %v2195_v3, %v1010_v49  ;;  %v847_v43 = vmul.f32 %v2210_v8, %v1107_v54  ;;  %v947_v55 = vmul.f32 %v1440_v24, %v2215_v14 }
  0xe4   : > { %v978_v62 = vadd.f32 %v946_v13, %v878_v31  ;;  %v781_v56 = vadd.f32 %v749_v12, %v683_v58  ;;  %v585_v42 = vadd.f32 %v553_v9, %v487_v33  ;;  %v1142_v29 = vmul.f32 %v2222_v22, %v1108_v40 }
  0xe5   : > { %1205 = vst [vmem:[%s1981_s17 + $0xe0] sm:$0xff] %v1173_v11  ;;  %v1045_v51 = vmul.f32 %v2195_v3, %v1011_v47  ;;  %v750_v45 = vmul.f32 %v2191_v35, %v1010_v49  ;;  %v848_v25 = vmul.f32 %v2210_v8, %v1108_v40  ;;  %v1143_v35 = vmul.f32 %v2222_v22, %v1109_v37 }
  0xe6   : > { %v1076_v6 = vadd.f32 %v1044_v50, %v978_v62  ;;  %v879_v57 = vadd.f32 %v847_v43, %v781_v56  ;;  %v684_v52 = vadd.f32 %v652_v59, %v585_v42  ;;  %v1046_v23 = vmul.f32 %v2195_v3, %v1012_v19 }
  0xe7   : > { %v1144_v27 = vmul.f32 %v2222_v22, %v1110_v7 }
  0xe8   : > { %v1174_v21 = vadd.f32 %v1142_v29, %v1076_v6  ;;  %v979_v20 = vadd.f32 %v947_v55, %v879_v57  ;;  %v782_v14 = vadd.f32 %v750_v45, %v684_v52 }
  0xea   : > { %1206 = vst [vmem:[%s1981_s17 + $0xe8] sm:$0xff] %v1174_v21  ;;  %v1077_v34 = vadd.f32 %v1045_v51, %v979_v20  ;;  %v880_v41 = vadd.f32 %v848_v25, %v782_v14 }
  0xec   : > { %v1175_v53 = vadd.f32 %v1143_v35, %v1077_v34  ;;  %v980_v36 = vadd.f32 %v947_v55, %v880_v41 }
  0xee   : > { %1207 = vst [vmem:[%s1981_s17 + $0xf0] sm:$0xff] %v1175_v53  ;;  %v1078_v8 = vadd.f32 %v1046_v23, %v980_v36 }
  0xf0   : > { %v1176_v63 = vadd.f32 %v1144_v27, %v1078_v8 }
  0xf2   : > { %1208 = vst [vmem:[%s1981_s17 + $0xf8] sm:$0xff] %v1176_v63 }
  0xf3   : > { %1528 = shalt.err (!%p1525_p0)
}
  0xf4   : > { %s1595_s30 = smov 128   ;;  %s1596_s5 = smov 8  }
  0xf5   : > { %1348 = dma.vmem_to_hbm [thread:$0]  (%p1691_p5), %s1224_s12, 4096, %s1226_s16, %s1210_s21, %s1595_s30, %s1595_s30, %s1596_s5  }
  0xf6 PF: > { %s1240_s7 = sand.u32 1, %s1567_s9   ;;  %p1359_p3 = pnand %p1327_p11, %p1661_p6 }
  0xf7   : > { %s1241_s15 = scalar_lea.sflag [#allocation5], %s1240_s7 }
  0xf8   : > { %p1360_p7 = pneg %p1359_p3 }
  0xfa   : > { %1562 = dma.done.wait (%p1360_p7), %s1241_s15, 4096  }
  0xfb   : > { %1564 = vsyncadd (%p1360_p7), %s1241_s15, 4294963200  ;;  %s19_s14 = sadd.s32 1, %s1587_s14   ;;  %s2350_s9 = smov %s1571_s10 }
  0xfc   : > { %p16_p9 = scmp.ge.s32.totalorder %s19_s14, 4   ;;  %s2351_s10 = smov %s1575_s11 }
  0xfd   : > { %s2352_s11 = smov %s1700_s8  ;;  %s2353_s12 = smov %s1583_s13 }
  0xfe   : > { %s2354_s13 = smov %s2356_s29  ;;  %18 = sbr.rel (!%p16_p9) target bundleno = 7 (0x7), region = 82 }
 0x103   :  { %1247 = vsyncpa [#allocation4], 1 }
 0x104   :  { %1249 = vsyncpa [#allocation4 + $0x1], 1 }
 0x105   :  { %1250 = vsyncpa [#allocation7], 1 }
 0x106   :  { %1251 = vsyncpa [#allocation5], 1 }
 0x107   :  { %1253 = vsyncpa [#allocation5 + $0x1], 1 }

</bundles_post_ra>
